<compile_context>
chip_gen: v7x
topology: tpu7x:2x2x1
jax: 0.10.0
libtpu: 0.0.40
codegen_flags: <defaults>
</compile_context>

<pallas_src>
import functools
import math

import jax
import jax.numpy as jnp
from jax import lax
from jax.experimental import pallas as pl
from jax.experimental.pallas import tpu as pltpu


# --------------------------------------------------------------------------
# Kernel
# --------------------------------------------------------------------------
def _layernorm_kernel(x_ref, g_ref, o_ref, *, eps, stable, inv_dim):
    # x_ref: (tm, D) tile, g_ref: (1, D)
    x = x_ref[...].astype(jnp.float32)
    if stable:
        # x / x.amax(dim=-1, keepdim=True).detach()
        # (approx reciprocal runs on the EUP; LayerNorm is invariant to a
        #  per-row rescale, so the approximation cancels up to eps terms.
        #  NOTE: rows whose max is 0 produce NaN/Inf and all-negative rows flip
        #  sign -- this mirrors the PyTorch reference.)
        row_max = jnp.max(x, axis=-1, keepdims=True)
        x = x * pl.reciprocal(row_max, approx=True)

    # One pass over the tile: sum and sum-of-squares together (lane-axis XLU
    # reductions), var = E[x^2] - mean^2 in f32.  Clamp at 0 to guard the mild
    # cancellation risk for rows with |mean| >> std (rsqrt of a tiny negative).
    s1 = jnp.sum(x, axis=-1, keepdims=True)
    s2 = jnp.sum(x * x, axis=-1, keepdims=True)
    mean = s1 * inv_dim
    var = jnp.maximum(s2 * inv_dim - mean * mean, 0.0)

    g = g_ref[...].astype(jnp.float32)
    inv_std = lax.rsqrt(var + eps)
    o_ref[...] = ((x - mean) * inv_std * g).astype(o_ref.dtype)


# --------------------------------------------------------------------------
# Tiling / VMEM heuristics
# --------------------------------------------------------------------------
def _round_up(x, m):
    return ((x + m - 1) // m) * m


def _tpu_vmem_capacity_bytes():
    """Per-TensorCore VMEM capacity; conservative v7x default if unknown."""
    try:
        cap = int(pltpu.get_tpu_info().vmem_capacity_bytes)
        if cap > 0:
            return cap
    except Exception:
        pass
    return 64 * 1024 * 1024  # v7x per-TC VMEM (smallest of the targets)


def _choose_block_rows(rows, dim, itemsize, vmem_budget):
    """Pick a row-tile size: byte-targeted per step, capped by VMEM budget."""
    sub = {4: 8, 2: 16, 1: 32}.get(itemsize, 8)  # packed sublane quantum
    if rows <= sub:
        return rows  # single block equal to the full row extent

    # HBM bytes moved per row per grid step (input tile read + output write).
    hbm_bytes_per_row = 2 * dim * itemsize
    # VMEM footprint per row: double-buffered in + out tiles (input dtype)
    # plus ~2 tile-sized f32 temporaries (f32 promotion / fused square).
    vmem_bytes_per_row = dim * (4 * itemsize + 2 * 4)

    # ~8 MiB of in+out HBM traffic per step: <~10% per-step overhead at v7x
    # bandwidth, and well past the ~3 MiB/step roofline plateau on v6e/v5e.
    target_step_bytes = 8 * 1024 * 1024
    tm = max(sub, target_step_bytes // hbm_bytes_per_row)

    # Generation-aware VMEM cap.
    tm = min(tm, max(sub, vmem_budget // vmem_bytes_per_row))

    # Keep >= ~8 grid steps (>= ~4 per TensorCore on a 2-TC v7x) when rows
    # permit so the pipeline reaches steady state and both cores stay busy --
    # but never shrink a step below ~1 MiB of traffic (overhead-dominated).
    min_tm = max(sub, (1024 * 1024) // hbm_bytes_per_row)
    steps_tm = _round_up(pl.cdiv(rows, 8), sub)
    if steps_tm >= min_tm:
        tm = min(tm, steps_tm)

    tm = min(tm, _round_up(rows, sub))
    tm = max(sub, (tm // sub) * sub)
    return tm


# --------------------------------------------------------------------------
# Wrappers
# --------------------------------------------------------------------------
def _layernorm_jax(x, g, *, eps, stable):
    """Plain-XLA path for small / non-lane-dense feature dims (dim < 128)."""
    xf = x.astype(jnp.float32)
    if stable:
        xf = xf / jnp.max(xf, axis=-1, keepdims=True)
    mean = jnp.mean(xf, axis=-1, keepdims=True)
    var = jnp.mean((xf - mean) ** 2, axis=-1, keepdims=True)
    return ((xf - mean) * lax.rsqrt(var + eps) * g.astype(jnp.float32)).astype(x.dtype)


def layernorm(x, g, *, eps=1e-5, fp16_eps=1e-3, stable=False, block_rows=None):
    """Pallas LayerNorm matching the PyTorch module's forward."""
    orig_shape = x.shape
    dim = orig_shape[-1]
    assert g.shape == (dim,)

    # eps choice is static on dtype (fp32 vs lower precision), as in PyTorch.
    eff_eps = eps if x.dtype == jnp.float32 else fp16_eps

    # dim << 128 would lower to masked partial stores at tiny lane utilization;
    # use the reference-correct XLA path there (e.g. the module's dim=10 demo).
    if dim < 128:
        return _layernorm_jax(x, g, eps=eff_eps, stable=stable)

    # Flatten leading dims to rows.
    rows = int(math.prod(orig_shape[:-1])) if len(orig_shape) > 1 else 1
    x2 = x.reshape(rows, dim)
    g2 = g.reshape(1, dim)

    itemsize = jnp.dtype(x.dtype).itemsize

    # Generation-aware VMEM budgeting (v7x: 64 MiB/TC, v5e/v6e: 128 MiB).
    vmem_cap = _tpu_vmem_capacity_bytes()
    vmem_ceiling = int(0.85 * vmem_cap)                      # Mosaic scratch headroom
    tile_budget = max(16 * 1024 * 1024, vmem_ceiling - 8 * 1024 * 1024)

    tm = block_rows if block_rows is not None else _choose_block_rows(
        rows, dim, itemsize, tile_budget)

    grid = (pl.cdiv(rows, tm),)  # partial last block handled by Pallas, no padding copy

    # Scoped-VMEM limit sized to the chosen tile (double-buffered in/out tiles
    # + f32 temporaries), capped below the chip's physical VMEM.
    tile_bytes = tm * dim * (4 * itemsize + 2 * 4)
    vmem_limit = int(min(vmem_ceiling,
                         max(32 * 1024 * 1024, tile_bytes + 8 * 1024 * 1024)))

    kernel = functools.partial(
        _layernorm_kernel, eps=eff_eps, stable=stable, inv_dim=1.0 / dim
    )

    def run(dim_sem):
        return pl.pallas_call(
            kernel,
            out_shape=jax.ShapeDtypeStruct((rows, dim), x.dtype),
            grid_spec=pltpu.PrefetchScalarGridSpec(
                num_scalar_prefetch=0,
                grid=grid,
                in_specs=[
                    pl.BlockSpec((tm, dim), lambda i: (i, 0)),
                    pl.BlockSpec((1, dim), lambda i: (0, 0)),
                ],
                out_specs=pl.BlockSpec((tm, dim), lambda i: (i, 0)),
            ),
            compiler_params=pltpu.CompilerParams(
                dimension_semantics=dim_sem,
                vmem_limit_bytes=vmem_limit,
            ),
        )(x2, g2)

    if grid[0] >= 2:
        # Explicitly shard the row-grid axis across TensorCores (v7x has 2 TCs;
        # plain "parallel" barely changes codegen).  Fall back if the compiler
        # or chip rejects CORE_PARALLEL (e.g. grid not divisible by core count).
        try:
            out = run((pltpu.CORE_PARALLEL,))
        except Exception:
            out = run(("parallel",))
    else:
        out = run(("parallel",))

    return out.reshape(orig_shape)


def layernorm_ref(x, g, *, eps=1e-5, fp16_eps=1e-3, stable=False):
    """Pure-JAX (f32) reference mirroring the PyTorch forward."""
    eff_eps = eps if x.dtype == jnp.float32 else fp16_eps
    xf = x.astype(jnp.float32)
    if stable:
        xf = xf / jnp.max(xf, axis=-1, keepdims=True)
    mean = jnp.mean(xf, axis=-1, keepdims=True)
    var = jnp.mean((xf - mean) ** 2, axis=-1, keepdims=True)
    return (xf - mean) * lax.rsqrt(var + eff_eps) * g.astype(jnp.float32)


if __name__ == "__main__":
    key = jax.random.PRNGKey(0)
    k1, k2, k3 = jax.random.split(key, 3)

    # ---- main Pallas path: lane-dense dim, f32 -------------------------------
    x = jax.random.normal(k1, (4, 64, 256), dtype=jnp.float32)
    g = jnp.ones((256,), dtype=jnp.float32)  # nn.Parameter(torch.ones(dim))

    out = jax.block_until_ready(layernorm(x, g))
    ref = layernorm_ref(x, g)
    assert out.shape == x.shape and out.dtype == x.dtype
    assert jnp.allclose(out.astype(jnp.float32), ref, atol=2e-5, rtol=2e-5)

    # ---- non-divisible row count (partial last block, no padding copy) ------
    x_r = jax.random.normal(k2, (200, 256), dtype=jnp.float32)
    out_r = jax.block_until_ready(layernorm(x_r, g))
    ref_r = layernorm_ref(x_r, g)
    assert jnp.allclose(out_r.astype(jnp.float32), ref_r, atol=2e-5, rtol=2e-5)

    # ---- multi-step grid (exercises partial block + TC-sharded row axis) ----
    out_g = jax.block_until_ready(layernorm(x_r, g, block_rows=64))
    assert jnp.allclose(out_g.astype(jnp.float32), ref_r, atol=2e-5, rtol=2e-5)

    # ---- stable=True path (approx reciprocal on EUP) --------------------------
    x_s = jnp.abs(x) + 0.5  # keep row max positive (matches reference semantics)
    out_s = jax.block_until_ready(layernorm(x_s, g, stable=True))
    ref_s = layernorm_ref(x_s, g, stable=True)
    assert jnp.allclose(out_s.astype(jnp.float32), ref_s, atol=1e-4, rtol=1e-4)

    # ---- bf16 path (fp16_eps, 16-row sublane packing) ------------------------
    x_b = jax.random.normal(k3, (256, 256), dtype=jnp.bfloat16)
    g_b = jnp.ones((256,), dtype=jnp.bfloat16)
    out_b = jax.block_until_ready(layernorm(x_b, g_b))
    ref_b = layernorm_ref(x_b, g_b)
    assert out_b.dtype == jnp.bfloat16
    assert jnp.allclose(out_b.astype(jnp.float32), ref_b, atol=5e-2, rtol=5e-2)

    # ---- module's original usage (dim=10) goes through the XLA fallback ------
    x_tiny = jax.random.normal(k1, (32, 10), dtype=jnp.float32)
    g_tiny = jnp.ones((10,), dtype=jnp.float32)
    out_tiny = jax.block_until_ready(layernorm(x_tiny, g_tiny))
    assert jnp.allclose(out_tiny.astype(jnp.float32), layernorm_ref(x_tiny, g_tiny),
                        atol=2e-5, rtol=2e-5)

    print("KERNEL_OK")
</pallas_src>

<mosaic_0001>
module attributes {stable_mosaic.version = 11 : i64} {
  func.func @_layernorm_kernel(%arg0: i32, %arg1: memref<256x256xf32, #tpu.memory_space<vmem>>, %arg2: memref<1x256xf32, #tpu.memory_space<vmem>>, %arg3: memref<256x256xf32, #tpu.memory_space<vmem>>) attributes {dimension_semantics = [#tpu.dimension_semantics<parallel>], iteration_bounds = array<i64: 1>, scalar_prefetch = 0 : i64, scratch_operands = 0 : i64, tpu.core_type = #tpu.core_type<tc>, window_params = [{transform_indices = @transform_0, window_bounds = array<i64: 256, 256>}, {pipeline_mode = #tpu.pipeline_mode<synchronous>, transform_indices = @transform_1, window_bounds = array<i64: 1, 256>}, {transform_indices = @transform_2, window_bounds = array<i64: 256, 256>}]} {
    %c0 = arith.constant 0 : index
    %c0_0 = arith.constant 0 : index
    %0 = vector.load %arg1[%c0, %c0_0] : memref<256x256xf32, #tpu.memory_space<vmem>>, vector<256x256xf32>
    %cst = arith.constant dense<0.000000e+00> : vector<256xf32>
    %1 = vector.multi_reduction <add>, %0, %cst [1] : vector<256x256xf32> to vector<256xf32>
    %2 = vector.shape_cast %1 : vector<256xf32> to vector<256x1xf32>
    %3 = arith.mulf %0, %0 : vector<256x256xf32>
    %cst_1 = arith.constant dense<0.000000e+00> : vector<256xf32>
    %4 = vector.multi_reduction <add>, %3, %cst_1 [1] : vector<256x256xf32> to vector<256xf32>
    %5 = vector.shape_cast %4 : vector<256xf32> to vector<256x1xf32>
    %cst_2 = arith.constant 3.906250e-03 : f32
    %6 = vector.broadcast %cst_2 : f32 to vector<256x1xf32>
    %7 = arith.mulf %2, %6 : vector<256x1xf32>
    %cst_3 = arith.constant 3.906250e-03 : f32
    %8 = vector.broadcast %cst_3 : f32 to vector<256x1xf32>
    %9 = arith.mulf %5, %8 : vector<256x1xf32>
    %10 = arith.mulf %7, %7 : vector<256x1xf32>
    %11 = arith.subf %9, %10 : vector<256x1xf32>
    %cst_4 = arith.constant 0.000000e+00 : f32
    %12 = vector.broadcast %cst_4 : f32 to vector<256x1xf32>
    %13 = arith.maximumf %11, %12 : vector<256x1xf32>
    %c0_5 = arith.constant 0 : index
    %c0_6 = arith.constant 0 : index
    %14 = vector.load %arg2[%c0_5, %c0_6] : memref<1x256xf32, #tpu.memory_space<vmem>>, vector<1x256xf32>
    %cst_7 = arith.constant 9.99999974E-6 : f32
    %15 = vector.broadcast %cst_7 : f32 to vector<256x1xf32>
    %16 = arith.addf %13, %15 : vector<256x1xf32>
    %17 = math.rsqrt %16 : vector<256x1xf32>
    %18 = vector.broadcast %7 : vector<256x1xf32> to vector<256x256xf32>
    %19 = arith.subf %0, %18 : vector<256x256xf32>
    %20 = vector.broadcast %17 : vector<256x1xf32> to vector<256x256xf32>
    %21 = arith.mulf %19, %20 : vector<256x256xf32>
    %22 = vector.broadcast %14 : vector<1x256xf32> to vector<256x256xf32>
    %23 = arith.mulf %21, %22 : vector<256x256xf32>
    %c0_8 = arith.constant 0 : index
    %c0_9 = arith.constant 0 : index
    %24 = vector.load %arg3[%c0_8, %c0_9] : memref<256x256xf32, #tpu.memory_space<vmem>>, vector<256x256xf32>
    tpu.vector_store %arg3[%c0_8, %c0_9], %23 {strides = array<i32>} : memref<256x256xf32, #tpu.memory_space<vmem>>, vector<256x256xf32>,
    return
  }
  func.func @transform_0(%arg0: i32) -> (i32, i32) {
    %c0_i32 = arith.constant 0 : i32
    %c0_i32_0 = arith.constant 0 : i32
    return %arg0, %c0_i32 : i32, i32
  }
  func.func @transform_1(%arg0: i32) -> (i32, i32) {
    %c0_i32 = arith.constant 0 : i32
    %c0_i32_0 = arith.constant 0 : i32
    %c0_i32_1 = arith.constant 0 : i32
    return %c0_i32, %c0_i32_0 : i32, i32
  }
  func.func @transform_2(%arg0: i32) -> (i32, i32) {
    %c0_i32 = arith.constant 0 : i32
    %c0_i32_0 = arith.constant 0 : i32
    return %arg0, %c0_i32 : i32, i32
  }
}

</mosaic_0001>

<bundles_post_ra>
// kernel: tpu_custom_call.1
= control target key start
LH: loop header
LB: loop body
LE: loop exit
PB: predicated region body
PF: predicated region fallthrough
CT: control target
= control target key end

     0   :  { %7 = vsyncpa [#allocation3], 0  ;;  %s1973_s0 = inlined_call_operand.hbm [shape: f32[256,256], index: 0, kind: input, shape index: {}]   ;;  %s1974_s1 = inlined_call_operand.vmem [shape: f32[1,256], index: 1, kind: input, shape index: {}]   ;;  %s1975_s2 = inlined_call_operand.hbm [shape: f32[256,256], index: 2, kind: output, shape index: {}]  }
   0x1   :  { %8 = vsyncpa [#allocation4], 0  ;;  %s983_s9 = smov [#allocation2]   ;;  %s935_s13 = scalar_lea.hbm %s1973_s0, 8192 }
   0x2   :  { %s14_s10 = sshll.u32 %s983_s9, 4  ;;  %p936_p0 = scmp.ne.s32.totalorder %s1973_s0, %s935_s13  ;;  %s15_s10 = int_to_ptr.vmem [resolvable:$true] %s14_s10 }
   0x3   :  { %p939_p1 = scmp.lt.u32.totalorder %s935_s13, %s1973_s0 }
   0x5   :  { %p941_p2 = pnand %p939_p1, %p936_p0 }
   0x7   :  { %944 = shalt.err (!%p941_p2)
}
   0x8   :  { %s945_s18 = scalar_lea.vmem %s15_s10, 8192  ;;  %p950_p4 = scmp.lt.s32.totalorder %s15_s10, %s15_s10 }
   0x9   :  { %p946_p3 = scmp.ne.s32.totalorder %s15_s10, %s945_s18  ;;  %p951_p5 = scmp.lt.s32.totalorder %s945_s18, %s945_s18 }
   0xb   :  { %p952_p6 = por %p951_p5, %p950_p4 }
   0xd   :  { %p953_p7 = pnand %p952_p6, %p946_p3 }
   0xf   :  { %956 = shalt.err (!%p953_p7)
}
  0x10   :  { %s984_s19 = smov 256   ;;  %s985_s20 = smov 16  }
  0x11   :  { %20 = dma.hbm_to_vmem [thread:$0]  %s1973_s0, 8192, %s15_s10, [#allocation3], %s984_s19, %s984_s19, %s985_s20  }
  0x12   :  { %979 = dma.done.wait [#allocation3], 8192  }
  0x13   :  { %980 = vsyncadd [#allocation3], 4294959104  ;;  %v1017_v0 = vld [vmem:[#allocation2 + $0x20] sm:$0xff]  ;;  %v1019_v1 = vld [vmem:[#allocation2 + $0x28] sm:$0xff] }
  0x14   :  { %2092 = vst [vmem:[#allocation8_spill] sm:$0xff] %v1017_v0  ;;  %2093 = vst [vmem:[#allocation9_spill] sm:$0xff] %v1019_v1  ;;  %v1021_v2 = vld [vmem:[#allocation2] sm:$0xff]  ;;  %v96_v3 = vadd.f32 %v1019_v1, %v1017_v0  ;;  %v1025_v4 = vld [vmem:[#allocation2 + $0x8] sm:$0xff] }
  0x15   :  { %2094 = vst [vmem:[#allocation10_spill] sm:$0xff] %v1021_v2  ;;  %v1027_v5 = vld [vmem:[#allocation2 + $0x30] sm:$0xff]  ;;  %v1029_v6 = vld [vmem:[#allocation2 + $0x38] sm:$0xff]  ;;  %v90_v7 = vadd.f32 %v1025_v4, %v1021_v2  ;;  %v1045_v14 = vld [vmem:[#allocation2 + $0x40] sm:$0xff] }
  0x16   :  { %2095 = vst [vmem:[#allocation11_spill] sm:$0xff] %v1027_v5  ;;  %2096 = vst [vmem:[#allocation12_spill] sm:$0xff] %v1029_v6  ;;  %v1033_v8 = vld [vmem:[#allocation2 + $0x10] sm:$0xff]  ;;  %v1035_v9 = vld [vmem:[#allocation2 + $0x18] sm:$0xff]  ;;  %97 = vadd.xlane.f32.xlu1 %v96_v3  ;;  %v99_v10 = vadd.f32 %v1029_v6, %v1027_v5 }
  0x17   :  { %2097 = vst [vmem:[#allocation13_spill] sm:$0xff] %v1033_v8  ;;  %2098 = vst [vmem:[#allocation14_spill] sm:$0xff] %v1035_v9  ;;  %91 = vadd.xlane.f32.xlu0 %v90_v7  ;;  %v93_v11 = vadd.f32 %v1035_v9, %v1033_v8  ;;  %v1041_v12 = vld [vmem:[#allocation2 + $0x50] sm:$0xff]  ;;  %v1043_v13 = vld [vmem:[#allocation2 + $0x58] sm:$0xff] }
  0x18   :  { %2099 = vst [vmem:[#allocation15_spill] sm:$0xff] %v1041_v12  ;;  %2100 = vst [vmem:[#allocation16_spill] sm:$0xff] %v1045_v14  ;;  %v1047_v15 = vld [vmem:[#allocation2 + $0x48] sm:$0xff]  ;;  %v105_v16 = vadd.f32 %v1043_v13, %v1041_v12  ;;  %v1053_v18 = vld [vmem:[#allocation2 + $0x70] sm:$0xff] }
  0x19   :  { %2101 = vst [vmem:[#allocation17_spill] sm:$0xff] %v1047_v15  ;;  %v102_v17 = vadd.f32 %v1047_v15, %v1045_v14  ;;  %2102 = vst [vmem:[#allocation18_spill] sm:$0xff] %v1053_v18  ;;  %v1055_v19 = vld [vmem:[#allocation2 + $0x78] sm:$0xff]  ;;  %v1057_v20 = vld [vmem:[#allocation2 + $0x60] sm:$0xff] }
  0x1a   :  { %100 = vadd.xlane.f32.xlu1 %v99_v10  ;;  %2103 = vst [vmem:[#allocation19_spill] sm:$0xff] %v1057_v20  ;;  %v1059_v21 = vld [vmem:[#allocation2 + $0x68] sm:$0xff]  ;;  %v111_v22 = vadd.f32 %v1055_v19, %v1053_v18  ;;  %v1065_v24 = vld [vmem:[#allocation2 + $0x90] sm:$0xff]  ;;  %v1067_v25 = vld [vmem:[#allocation2 + $0x98] sm:$0xff] }
  0x1b   :  { %94 = vadd.xlane.f32.xlu0 %v93_v11  ;;  %2104 = vst [vmem:[#allocation20_spill] sm:$0xff] %v1059_v21  ;;  %v108_v23 = vadd.f32 %v1059_v21, %v1057_v20  ;;  %2105 = vst [vmem:[#allocation21_spill] sm:$0xff] %v1065_v24  ;;  %v1069_v26 = vld [vmem:[#allocation2 + $0x80] sm:$0xff]  ;;  %v1071_v27 = vld [vmem:[#allocation2 + $0x88] sm:$0xff]  ;;  %v117_v28 = vadd.f32 %v1067_v25, %v1065_v24 }
  0x1c   :  { %2106 = vst [vmem:[#allocation22_spill] sm:$0xff] %v1071_v27  ;;  %v114_v29 = vadd.f32 %v1071_v27, %v1069_v26  ;;  %v1077_v30 = vld [vmem:[#allocation2 + $0xb0] sm:$0xff]  ;;  %v1079_v31 = vld [vmem:[#allocation2 + $0xb8] sm:$0xff]  ;;  %v1081_v32 = vld [vmem:[#allocation2 + $0xa0] sm:$0xff] }
  0x1d   :  { %2107 = vst [vmem:[#allocation23_spill] sm:$0xff] %v1077_v30  ;;  %2108 = vst [vmem:[#allocation24_spill] sm:$0xff] %v1079_v31  ;;  %v1083_v33 = vld [vmem:[#allocation2 + $0xa8] sm:$0xff]  ;;  %v123_v34 = vadd.f32 %v1079_v31, %v1077_v30  ;;  %v1089_v36 = vld [vmem:[#allocation2 + $0xd0] sm:$0xff] }
  0x1e   :  { %106 = vadd.xlane.f32.xlu1 %v105_v16  ;;  %2109 = vst [vmem:[#allocation25_spill] sm:$0xff] %v1081_v32  ;;  %2110 = vst [vmem:[#allocation26_spill] sm:$0xff] %v1083_v33  ;;  %v120_v35 = vadd.f32 %v1083_v33, %v1081_v32  ;;  %v1091_v37 = vld [vmem:[#allocation2 + $0xd8] sm:$0xff]  ;;  %v1093_v38 = vld [vmem:[#allocation2 + $0xc0] sm:$0xff] }
  0x1f   :  { %103 = vadd.xlane.f32.xlu0 %v102_v17  ;;  %2111 = vst [vmem:[#allocation27_spill] sm:$0xff] %v1089_v36  ;;  %2112 = vst [vmem:[#allocation28_spill] sm:$0xff] %v1091_v37  ;;  %v1095_v39 = vld [vmem:[#allocation2 + $0xc8] sm:$0xff]  ;;  %v129_v40 = vadd.f32 %v1091_v37, %v1089_v36  ;;  %v1101_v42 = vld [vmem:[#allocation2 + $0xf0] sm:$0xff] }
  0x20   :  { %2113 = vst [vmem:[#allocation29_spill] sm:$0xff] %v1093_v38  ;;  %2114 = vst [vmem:[#allocation30_spill] sm:$0xff] %v1095_v39  ;;  %v126_v41 = vadd.f32 %v1095_v39, %v1093_v38  ;;  %v1103_v43 = vld [vmem:[#allocation2 + $0xf8] sm:$0xff]  ;;  %v1105_v44 = vld [vmem:[#allocation2 + $0xe0] sm:$0xff] }
  0x21   :  { %2115 = vst [vmem:[#allocation31_spill] sm:$0xff] %v1101_v42  ;;  %2116 = vst [vmem:[#allocation32_spill] sm:$0xff] %v1103_v43  ;;  %v1107_v45 = vld [vmem:[#allocation2 + $0xe8] sm:$0xff]  ;;  %v135_v46 = vadd.f32 %v1103_v43, %v1101_v42  ;;  %v1113_v48 = vld [vmem:[#allocation2 + $0x110] sm:$0xff] }
  0x22   :  { %112 = vadd.xlane.f32.xlu1 %v111_v22  ;;  %2117 = vst [vmem:[#allocation33_spill] sm:$0xff] %v1105_v44  ;;  %2118 = vst [vmem:[#allocation34_spill] sm:$0xff] %v1107_v45  ;;  %v132_v47 = vadd.f32 %v1107_v45, %v1105_v44  ;;  %v1115_v49 = vld [vmem:[#allocation2 + $0x118] sm:$0xff]  ;;  %v1117_v50 = vld [vmem:[#allocation2 + $0x100] sm:$0xff] }
  0x23   :  { %109 = vadd.xlane.f32.xlu0 %v108_v23  ;;  %2119 = vst [vmem:[#allocation35_spill] sm:$0xff] %v1113_v48  ;;  %2120 = vst [vmem:[#allocation36_spill] sm:$0xff] %v1115_v49  ;;  %v1119_v51 = vld [vmem:[#allocation2 + $0x108] sm:$0xff]  ;;  %v141_v52 = vadd.f32 %v1115_v49, %v1113_v48  ;;  %v1125_v54 = vld [vmem:[#allocation2 + $0x130] sm:$0xff] }
  0x24   :  { %2121 = vst [vmem:[#allocation37_spill] sm:$0xff] %v1117_v50  ;;  %2122 = vst [vmem:[#allocation38_spill] sm:$0xff] %v1119_v51  ;;  %v138_v53 = vadd.f32 %v1119_v51, %v1117_v50  ;;  %v1127_v55 = vld [vmem:[#allocation2 + $0x138] sm:$0xff]  ;;  %v1129_v56 = vld [vmem:[#allocation2 + $0x120] sm:$0xff] }
  0x25   :  { %2123 = vst [vmem:[#allocation39_spill] sm:$0xff] %v1125_v54  ;;  %2124 = vst [vmem:[#allocation40_spill] sm:$0xff] %v1127_v55  ;;  %v1131_v57 = vld [vmem:[#allocation2 + $0x128] sm:$0xff]  ;;  %v147_v58 = vadd.f32 %v1127_v55, %v1125_v54  ;;  %v1137_v60 = vld [vmem:[#allocation2 + $0x150] sm:$0xff] }
  0x26   :  { %118 = vadd.xlane.f32.xlu1 %v117_v28  ;;  %2125 = vst [vmem:[#allocation41_spill] sm:$0xff] %v1129_v56  ;;  %2126 = vst [vmem:[#allocation42_spill] sm:$0xff] %v1131_v57  ;;  %v144_v59 = vadd.f32 %v1131_v57, %v1129_v56  ;;  %v1139_v61 = vld [vmem:[#allocation2 + $0x158] sm:$0xff]  ;;  %v1141_v62 = vld [vmem:[#allocation2 + $0x140] sm:$0xff] }
  0x27   :  { %115 = vadd.xlane.f32.xlu0 %v114_v29  ;;  %2127 = vst [vmem:[#allocation43_spill] sm:$0xff] %v1137_v60  ;;  %2128 = vst [vmem:[#allocation44_spill] sm:$0xff] %v1139_v61  ;;  %v1143_v63 = vld [vmem:[#allocation2 + $0x148] sm:$0xff]  ;;  %v153_v3 = vadd.f32 %v1139_v61, %v1137_v60  ;;  %v1149_v10 = vld [vmem:[#allocation2 + $0x170] sm:$0xff] }
  0x28   :  { %2129 = vst [vmem:[#allocation45_spill] sm:$0xff] %v1141_v62  ;;  %2130 = vst [vmem:[#allocation46_spill] sm:$0xff] %v1143_v63  ;;  %v150_v7 = vadd.f32 %v1143_v63, %v1141_v62  ;;  %v1151_v11 = vld [vmem:[#allocation2 + $0x178] sm:$0xff]  ;;  %v1153_v16 = vld [vmem:[#allocation2 + $0x160] sm:$0xff] }
  0x29   :  { %2131 = vst [vmem:[#allocation47_spill] sm:$0xff] %v1149_v10  ;;  %2132 = vst [vmem:[#allocation48_spill] sm:$0xff] %v1151_v11  ;;  %v1155_v17 = vld [vmem:[#allocation2 + $0x168] sm:$0xff]  ;;  %v159_v22 = vadd.f32 %v1151_v11, %v1149_v10  ;;  %v1161_v28 = vld [vmem:[#allocation2 + $0x190] sm:$0xff] }
  0x2a   :  { %124 = vadd.xlane.f32.xlu1 %v123_v34  ;;  %2133 = vst [vmem:[#allocation49_spill] sm:$0xff] %v1153_v16  ;;  %2134 = vst [vmem:[#allocation50_spill] sm:$0xff] %v1155_v17  ;;  %v156_v23 = vadd.f32 %v1155_v17, %v1153_v16  ;;  %v1163_v29 = vld [vmem:[#allocation2 + $0x198] sm:$0xff]  ;;  %v1165_v34 = vld [vmem:[#allocation2 + $0x180] sm:$0xff] }
  0x2b   :  { %121 = vadd.xlane.f32.xlu0 %v120_v35  ;;  %2135 = vst [vmem:[#allocation51_spill] sm:$0xff] %v1161_v28  ;;  %2136 = vst [vmem:[#allocation52_spill] sm:$0xff] %v1163_v29  ;;  %v1167_v35 = vld [vmem:[#allocation2 + $0x188] sm:$0xff] }
  0x2c   :  { %2137 = vst [vmem:[#allocation53_spill] sm:$0xff] %v1165_v34  ;;  %2138 = vst [vmem:[#allocation54_spill] sm:$0xff] %v1167_v35 }
  0x2e   :  { %130 = vadd.xlane.f32.xlu1 %v129_v40  ;;  %v165_v40 = vadd.f32 %v1163_v29, %v1161_v28 }
  0x2f   :  { %127 = vadd.xlane.f32.xlu0 %v126_v41  ;;  %v162_v41 = vadd.f32 %v1167_v35, %v1165_v34 }
  0x32   :  { %136 = vadd.xlane.f32.xlu1 %v135_v46  ;;  %v1173_v46 = vld [vmem:[#allocation2 + $0x1b0] sm:$0xff] }
  0x33   :  { %133 = vadd.xlane.f32.xlu0 %v132_v47  ;;  %2139 = vst [vmem:[#allocation55_spill] sm:$0xff] %v1173_v46  ;;  %v1175_v47 = vld [vmem:[#allocation2 + $0x1b8] sm:$0xff] }
  0x34   :  { %2140 = vst [vmem:[#allocation56_spill] sm:$0xff] %v1175_v47 }
  0x36   :  { %142 = vadd.xlane.f32.xlu1 %v141_v52  ;;  %v1177_v52 = vld [vmem:[#allocation2 + $0x1a0] sm:$0xff] }
  0x37   :  { %139 = vadd.xlane.f32.xlu0 %v138_v53  ;;  %2141 = vst [vmem:[#allocation57_spill] sm:$0xff] %v1177_v52  ;;  %v1179_v53 = vld [vmem:[#allocation2 + $0x1a8] sm:$0xff] }
  0x38   :  { %2142 = vst [vmem:[#allocation58_spill] sm:$0xff] %v1179_v53 }
  0x3a   :  { %148 = vadd.xlane.f32.xlu1 %v147_v58  ;;  %v171_v58 = vadd.f32 %v1175_v47, %v1173_v46  ;;  %v1199_v47 = vld [vmem:[#allocation2 + $0x1f8] sm:$0xff] }
  0x3b   :  { %145 = vadd.xlane.f32.xlu0 %v144_v59  ;;  %v168_v59 = vadd.f32 %v1179_v53, %v1177_v52  ;;  %2146 = vst [vmem:[#allocation62_spill] sm:$0xff] %v1199_v47  ;;  %v1201_v53 = vld [vmem:[#allocation2 + $0x1e0] sm:$0xff]  ;;  %v1203_v52 = vld [vmem:[#allocation2 + $0x1e8] sm:$0xff] }
  0x3c   :  { %2147 = vst [vmem:[#allocation63_spill] sm:$0xff] %v1203_v52 }
  0x3e   :  { %154 = vadd.xlane.f32.xlu1 %v153_v3  ;;  %v1185_v3 = vld [vmem:[#allocation2 + $0x1d0] sm:$0xff] }
  0x3f   :  { %151 = vadd.xlane.f32.xlu0 %v150_v7  ;;  %v1187_v7 = vld [vmem:[#allocation2 + $0x1d8] sm:$0xff] }
  0x40   :  { %2143 = vst [vmem:[#allocation59_spill] sm:$0xff] %v1187_v7  ;;  %v177_v35 = vadd.f32 %v1187_v7, %v1185_v3  ;;  %v187_v7 = vmul.f32 %v1025_v4, %v1025_v4 }
  0x42   :  { %160 = vadd.xlane.f32.xlu1 %v159_v22  ;;  %v1189_v22 = vld [vmem:[#allocation2 + $0x1c0] sm:$0xff] }
  0x43   :  { %157 = vadd.xlane.f32.xlu0 %v156_v23  ;;  %2144 = vst [vmem:[#allocation60_spill] sm:$0xff] %v1189_v22  ;;  %v1191_v23 = vld [vmem:[#allocation2 + $0x1c8] sm:$0xff] }
  0x44   :  { %2145 = vst [vmem:[#allocation61_spill] sm:$0xff] %v1191_v23 }
  0x46   :  { %166 = vadd.xlane.f32.xlu1 %v165_v40  ;;  %v174_v40 = vadd.f32 %v1191_v23, %v1189_v22  ;;  %v180_v23 = vadd.f32 %v1203_v52, %v1201_v53  ;;  %v186_v22 = vmul.f32 %v1021_v2, %v1021_v2  ;;  %v191_v52 = vmul.f32 %v1019_v1, %v1019_v1 }
  0x47   :  { %163 = vadd.xlane.f32.xlu0 %v162_v41  ;;  %v1197_v41 = vld [vmem:[#allocation2 + $0x1f0] sm:$0xff] }
  0x48   :  { %v183_v46 = vadd.f32 %v1199_v47, %v1197_v41  ;;  %v192_v47 = vmul.f32 %v1027_v5, %v1027_v5 }
  0x4a   :  { %172 = vadd.xlane.f32.xlu1 %v171_v58  ;;  %v188_v58 = vmul.f32 %v1033_v8, %v1033_v8  ;;  %v193_v8 = vmul.f32 %v1029_v6, %v1029_v6 }
  0x4b   :  { %169 = vadd.xlane.f32.xlu0 %v168_v59  ;;  %v189_v59 = vmul.f32 %v1035_v9, %v1035_v9  ;;  %v250_v9 = vadd.f32 %v187_v7, %v186_v22  ;;  %v195_v7 = vmul.f32 %v1047_v15, %v1047_v15 }
  0x4c   :  { %v259_v2 = vadd.f32 %v193_v8, %v192_v47  ;;  %v201_v8 = vmul.f32 %v1055_v19, %v1055_v19 }
  0x4e   :  { %178 = vadd.xlane.f32.xlu1 %v177_v35  ;;  %v253_v35 = vadd.f32 %v189_v59, %v188_v58  ;;  %v197_v58 = vmul.f32 %v1043_v13, %v1043_v13 }
  0x4f   :  { %175 = vadd.xlane.f32.xlu0 %v174_v40  ;;  %v190_v40 = vmul.f32 %v1017_v0, %v1017_v0 }
  0x51   :  { %v256_v59 = vadd.f32 %v191_v52, %v190_v40  ;;  %v199_v52 = vmul.f32 %v1059_v21, %v1059_v21 }
  0x52   :  { %184 = vadd.xlane.f32.xlu1 %v183_v46  ;;  %v196_v46 = vmul.f32 %v1041_v12, %v1041_v12 }
  0x53   :  { %181 = vadd.xlane.f32.xlu0 %v180_v23  ;;  %v194_v23 = vmul.f32 %v1045_v14, %v1045_v14 }
  0x54   :  { %v265_v22 = vadd.f32 %v197_v58, %v196_v46  ;;  %v205_v46 = vmul.f32 %v1067_v25, %v1067_v25 }
  0x55   :  { %v262_v47 = vadd.f32 %v195_v7, %v194_v23  ;;  %v203_v23 = vmul.f32 %v1071_v27, %v1071_v27 }
  0x56   :  { %254 = vadd.xlane.f32.xlu1 %v253_v35  ;;  %v200_v35 = vmul.f32 %v1053_v18, %v1053_v18 }
  0x57   :  { %251 = vadd.xlane.f32.xlu0 %v250_v9  ;;  %v198_v9 = vmul.f32 %v1057_v20, %v1057_v20 }
  0x58   :  { %v271_v40 = vadd.f32 %v201_v8, %v200_v35  ;;  %v209_v35 = vmul.f32 %v1079_v31, %v1079_v31 }
  0x59   :  { %v268_v58 = vadd.f32 %v199_v52, %v198_v9  ;;  %v207_v9 = vmul.f32 %v1083_v33, %v1083_v33 }
  0x5a   :  { %260 = vadd.xlane.f32.xlu1 %v259_v2  ;;  %v204_v2 = vmul.f32 %v1065_v24, %v1065_v24 }
  0x5b   :  { %257 = vadd.xlane.f32.xlu0 %v256_v59  ;;  %v202_v59 = vmul.f32 %v1069_v26, %v1069_v26 }
  0x5c   :  { %v277_v7 = vadd.f32 %v205_v46, %v204_v2  ;;  %v213_v2 = vmul.f32 %v1091_v37, %v1091_v37 }
  0x5d   :  { %v274_v8 = vadd.f32 %v203_v23, %v202_v59  ;;  %v211_v59 = vmul.f32 %v1095_v39, %v1095_v39 }
  0x5e   :  { %266 = vadd.xlane.f32.xlu1 %v265_v22  ;;  %v208_v22 = vmul.f32 %v1077_v30, %v1077_v30 }
  0x5f   :  { %263 = vadd.xlane.f32.xlu0 %v262_v47  ;;  %v206_v47 = vmul.f32 %v1081_v32, %v1081_v32 }
  0x60   :  { %v283_v52 = vadd.f32 %v209_v35, %v208_v22  ;;  %v217_v22 = vmul.f32 %v1103_v43, %v1103_v43 }
  0x61   :  { %v280_v46 = vadd.f32 %v207_v9, %v206_v47  ;;  %v215_v47 = vmul.f32 %v1107_v45, %v1107_v45 }
  0x62   :  { %272 = vadd.xlane.f32.xlu1 %v271_v40  ;;  %v212_v40 = vmul.f32 %v1089_v36, %v1089_v36 }
  0x63   :  { %269 = vadd.xlane.f32.xlu0 %v268_v58  ;;  %v210_v58 = vmul.f32 %v1093_v38, %v1093_v38 }
  0x64   :  { %v289_v23 = vadd.f32 %v213_v2, %v212_v40  ;;  %v221_v40 = vmul.f32 %v1115_v49, %v1115_v49 }
  0x65   :  { %v286_v35 = vadd.f32 %v211_v59, %v210_v58  ;;  %v219_v58 = vmul.f32 %v1119_v51, %v1119_v51 }
  0x66   :  { %278 = vadd.xlane.f32.xlu1 %v277_v7  ;;  %v216_v7 = vmul.f32 %v1101_v42, %v1101_v42 }
  0x67   :  { %275 = vadd.xlane.f32.xlu0 %v274_v8  ;;  %v214_v8 = vmul.f32 %v1105_v44, %v1105_v44 }
  0x68   :  { %v295_v9 = vadd.f32 %v217_v22, %v216_v7  ;;  %v225_v7 = vmul.f32 %v1127_v55, %v1127_v55 }
  0x69   :  { %v292_v2 = vadd.f32 %v215_v47, %v214_v8  ;;  %v223_v8 = vmul.f32 %v1131_v57, %v1131_v57 }
  0x6a   :  { %284 = vadd.xlane.f32.xlu1 %v283_v52  ;;  %v220_v52 = vmul.f32 %v1113_v48, %v1113_v48 }
  0x6b   :  { %281 = vadd.xlane.f32.xlu0 %v280_v46  ;;  %v218_v46 = vmul.f32 %v1117_v50, %v1117_v50 }
  0x6c   :  { %v301_v59 = vadd.f32 %v221_v40, %v220_v52  ;;  %v229_v52 = vmul.f32 %v1139_v61, %v1139_v61 }
  0x6d   :  { %v298_v22 = vadd.f32 %v219_v58, %v218_v46  ;;  %v227_v46 = vmul.f32 %v1143_v63, %v1143_v63 }
  0x6e   :  { %290 = vadd.xlane.f32.xlu1 %v289_v23  ;;  %v224_v23 = vmul.f32 %v1125_v54, %v1125_v54 }
  0x6f   :  { %287 = vadd.xlane.f32.xlu0 %v286_v35  ;;  %v222_v35 = vmul.f32 %v1129_v56, %v1129_v56  ;;  %v506_v56 = vld [vmem:[%s1974_s1] sm:$0x3]  ;;  %s986_s1 = smov [#allocation5]  }
  0x70   :  { %v307_v47 = vadd.f32 %v225_v7, %v224_v23  ;;  %v233_v23 = vmul.f32 %v1151_v11, %v1151_v11  ;;  %v2149_v11 = vld [vmem:[#allocation55_spill] sm:$0xff]  ;;  %s843_s24 = sshll.u32 %s986_s1, 4  ;;  %s844_s24 = int_to_ptr.vmem [resolvable:$true] %s843_s24 }
  0x71   :  { %v304_v40 = vadd.f32 %v223_v8, %v222_v35  ;;  %v231_v35 = vmul.f32 %v1155_v17, %v1155_v17  ;;  %v2151_v17 = vld [vmem:[#allocation57_spill] sm:$0xff]  ;;  %s957_s25 = scalar_lea.vmem %s844_s24, 8192  ;;  %p962_p9 = scmp.lt.s32.totalorder %s844_s24, %s844_s24 }
  0x72   :  { %296 = vadd.xlane.f32.xlu1 %v295_v9  ;;  %v228_v9 = vmul.f32 %v1137_v60, %v1137_v60  ;;  %p958_p8 = scmp.ne.s32.totalorder %s844_s24, %s957_s25  ;;  %p963_p10 = scmp.lt.s32.totalorder %s957_s25, %s957_s25 }
  0x73   :  { %293 = vadd.xlane.f32.xlu0 %v292_v2  ;;  %v226_v2 = vmul.f32 %v1141_v62, %v1141_v62 }
  0x74   :  { %v313_v58 = vadd.f32 %v229_v52, %v228_v9  ;;  %v237_v9 = vmul.f32 %v1163_v29, %v1163_v29  ;;  %p964_p11 = por %p963_p10, %p962_p9 }
  0x75   :  { %v310_v7 = vadd.f32 %v227_v46, %v226_v2  ;;  %v2148_v2 = vld [vmem:[#allocation54_spill] sm:$0xff] }
  0x76   :  { %302 = vadd.xlane.f32.xlu1 %v301_v59  ;;  %v232_v59 = vmul.f32 %v1149_v10, %v1149_v10  ;;  %v235_v46 = vmul.f32 %v2148_v2, %v2148_v2  ;;  %v2154_v2 = vld [vmem:[#allocation60_spill] sm:$0xff]  ;;  %p965_p12 = pnand %p964_p11, %p958_p8 }
  0x77   :  { %299 = vadd.xlane.f32.xlu0 %v298_v22  ;;  %v230_v22 = vmul.f32 %v1153_v16, %v1153_v16 }
  0x78   :  { %v319_v8 = vadd.f32 %v233_v23, %v232_v59  ;;  %v2150_v59 = vld [vmem:[#allocation56_spill] sm:$0xff] }
  0x79   :  { %v316_v52 = vadd.f32 %v231_v35, %v230_v22  ;;  %v241_v23 = vmul.f32 %v2150_v59, %v2150_v59  ;;  %v2152_v22 = vld [vmem:[#allocation58_spill] sm:$0xff] }
  0x7a   :  { %308 = vadd.xlane.f32.xlu1 %v307_v47  ;;  %v236_v47 = vmul.f32 %v1161_v28, %v1161_v28  ;;  %v239_v35 = vmul.f32 %v2152_v22, %v2152_v22 }
  0x7b   :  { %305 = vadd.xlane.f32.xlu0 %v304_v40  ;;  %v234_v40 = vmul.f32 %v1165_v34, %v1165_v34 }
  0x7c   :  { %v325_v16 = vadd.f32 %v237_v9, %v236_v47  ;;  %v2153_v47 = vld [vmem:[#allocation59_spill] sm:$0xff] }
  0x7d   :  { %v322_v28 = vadd.f32 %v235_v46, %v234_v40  ;;  %v245_v9 = vmul.f32 %v2153_v47, %v2153_v47  ;;  %v2155_v40 = vld [vmem:[#allocation61_spill] sm:$0xff] }
  0x7e   :  { %314 = vadd.xlane.f32.xlu1 %v313_v58  ;;  %v240_v58 = vmul.f32 %v2149_v11, %v2149_v11  ;;  %v243_v46 = vmul.f32 %v2155_v40, %v2155_v40 }
  0x7f   :  { %311 = vadd.xlane.f32.xlu0 %v310_v7  ;;  %v238_v7 = vmul.f32 %v2151_v17, %v2151_v17 }
  0x80   :  { %v331_v34 = vadd.f32 %v241_v23, %v240_v58  ;;  %v2156_v58 = vld [vmem:[#allocation62_spill] sm:$0xff]  ;;  %v2157_v23 = vld [vmem:[#allocation63_spill] sm:$0xff] }
  0x81   :  { %v328_v11 = vadd.f32 %v239_v35, %v238_v7  ;;  %v249_v59 = vmul.f32 %v2156_v58, %v2156_v58  ;;  %v247_v7 = vmul.f32 %v2157_v23, %v2157_v23 }
  0x82   :  { %320 = vadd.xlane.f32.xlu1 %v319_v8  ;;  %v244_v8 = vmul.f32 %v1185_v3, %v1185_v3 }
  0x83   :  { %317 = vadd.xlane.f32.xlu0 %v316_v52  ;;  %v242_v52 = vmul.f32 %v2154_v2, %v2154_v2 }
  0x84   :  { %v337_v17 = vadd.f32 %v245_v9, %v244_v8 }
  0x85   :  { %v334_v3 = vadd.f32 %v243_v46, %v242_v52 }
  0x86   :  { %326 = vadd.xlane.f32.xlu1 %v325_v16  ;;  %v248_v16 = vmul.f32 %v1197_v41, %v1197_v41 }
  0x87   :  { %323 = vadd.xlane.f32.xlu0 %v322_v28  ;;  %v246_v28 = vmul.f32 %v1201_v53, %v1201_v53 }
  0x88   :  { %v343_v2 = vadd.f32 %v249_v59, %v248_v16 }
  0x89   :  { %v340_v22 = vadd.f32 %v247_v7, %v246_v28  ;;  %v700_v28 = vlaneseq }
  0x8a   :  { %332 = vadd.xlane.f32.xlu1 %v331_v34 }
  0x8b   :  { %329 = vadd.xlane.f32.xlu0 %v328_v11 }
  0x8e   :  { %338 = vadd.xlane.f32.xlu1 %v337_v17 }
  0x8f   :  { %335 = vadd.xlane.f32.xlu0 %v334_v3 }
  0x92   :  { %344 = vadd.xlane.f32.xlu1 %v343_v2 }
  0x93   :  { %341 = vadd.xlane.f32.xlu0 %v340_v22  ;;  %v701_v22 = vshrl.u32 %v700_v28, 7 }
  0x95   :  { %v702_v61 = vsub.s32 0, %v701_v22  ;;  %v706_v60 = vsub.s32 1, %v701_v22 }
  0x97   :  { %v1372_v22 = vrot.slane %v506_v56, %v702_v61  ;;  %v2164_v61 = vld [vmem:[#allocation14_spill] sm:$0xff] }
  0xa3   :  { %v98_v34 = vpop.xlane.xlu1 %97 }
  0xa4   :  { %v92_v35 = vpop.xlane.xlu0 %91  ;;  %v1353_v62 = vmul.f32 0.00390625, %v98_v34  ;;  %v2163_v34 = vld [vmem:[#allocation13_spill] sm:$0xff] }
  0xa5   :  { %v1355_v57 = vmul.f32 0.00390625, %v92_v35  ;;  %v1374_v35 = vrot.slane %v506_v56, %v706_v60 }
  0xa6   :  { %2159 = vst [vmem:[#allocation56_spill] sm:$0xff] %v1353_v62 }
  0xa7   :  { %v101_v41 = vpop.xlane.xlu1 %100  ;;  %v1396_v50 = vmul.f32 %v1355_v57, %v1355_v57 }
  0xa8   :  { %v95_v8 = vpop.xlane.xlu0 %94  ;;  %v1360_v55 = vmul.f32 0.00390625, %v101_v41  ;;  %v2162_v41 = vld [vmem:[#allocation10_spill] sm:$0xff] }
  0xa9   :  { %v1364_v51 = vmul.f32 0.00390625, %v95_v8  ;;  %v1384_v8 = vmul.f32 %v1353_v62, %v1353_v62 }
  0xaa   :  { %2160 = vst [vmem:[#allocation57_spill] sm:$0xff] %v1360_v55 }
  0xab   :  { %v107_v47 = vpop.xlane.xlu1 %106 }
  0xac   :  { %v104_v9 = vpop.xlane.xlu0 %103 }
  0xaf   :  { %v113_v11 = vpop.xlane.xlu1 %112 }
  0xb0   :  { %v110_v52 = vpop.xlane.xlu0 %109  ;;  %v1390_v56 = vmul.f32 0.00390625, %v113_v11  ;;  %v1408_v11 = vmul.f32 %v1360_v55, %v1360_v55 }
  0xb1   :  { %v1402_v1 = vmul.f32 0.00390625, %v110_v52 }
  0xb3   :  { %v119_v40 = vpop.xlane.xlu1 %118 }
  0xb4   :  { %v116_v46 = vpop.xlane.xlu0 %115  ;;  %v1414_v5 = vmul.f32 0.00390625, %v119_v40 }
  0xb5   :  { %v1424_v6 = vmul.f32 0.00390625, %v116_v46  ;;  %v1462_v46 = vmul.f32 %v1402_v1, %v1402_v1 }
  0xb6   :  { %v1472_v0 = vmul.f32 %v1414_v5, %v1414_v5 }
  0xb7   :  { %v125_v53 = vpop.xlane.xlu1 %124  ;;  %v1485_v49 = vmul.f32 %v1424_v6, %v1424_v6 }
  0xb8   :  { %v122_v58 = vpop.xlane.xlu0 %121  ;;  %v1434_v12 = vmul.f32 0.00390625, %v125_v53  ;;  %v1452_v53 = vmul.f32 %v1390_v56, %v1390_v56 }
  0xb9   :  { %v1446_v14 = vmul.f32 0.00390625, %v122_v58 }
  0xbb   :  { %v131_v29 = vpop.xlane.xlu1 %130  ;;  %2165 = vst [vmem:[#allocation59_spill] sm:$0xff] %v1446_v14  ;;  %v1509_v58 = vmul.f32 %v1446_v14, %v1446_v14 }
  0xbc   :  { %v128_v23 = vpop.xlane.xlu0 %127  ;;  %v1458_v15 = vmul.f32 0.00390625, %v131_v29 }
  0xbd   :  { %v1468_v20 = vmul.f32 0.00390625, %v128_v23 }
  0xbe   :  { %2166 = vst [vmem:[#allocation60_spill] sm:$0xff] %v1458_v15  ;;  %v1520_v18 = vmul.f32 %v1458_v15, %v1458_v15 }
  0xbf   :  { %v1337_v17 = vpop.xlane.xlu1 %136  ;;  %2167 = vst [vmem:[#allocation61_spill] sm:$0xff] %v1468_v20  ;;  %v1533_v32 = vmul.f32 %v1468_v20, %v1468_v20 }
  0xc0   :  { %v1339_v16 = vpop.xlane.xlu0 %133  ;;  %v1479_v24 = vmul.f32 0.00390625, %v1337_v17  ;;  %v1498_v17 = vmul.f32 %v1434_v12, %v1434_v12 }
  0xc1   :  { %v1492_v29 = vmul.f32 0.00390625, %v1339_v16 }
  0xc2   :  { %2168 = vst [vmem:[#allocation62_spill] sm:$0xff] %v1479_v24 }
  0xc3   :  { %v1341_v59 = vpop.xlane.xlu1 %142  ;;  %2169 = vst [vmem:[#allocation63_spill] sm:$0xff] %v1492_v29  ;;  %v1557_v38 = vmul.f32 %v1492_v29, %v1492_v29 }
  0xc4   :  { %v1343_v3 = vpop.xlane.xlu0 %139  ;;  %v1505_v23 = vmul.f32 0.00390625, %v1341_v59 }
  0xc5   :  { %v1516_v31 = vmul.f32 0.00390625, %v1343_v3 }
  0xc6   :  { %2170 = vst [vmem:[#allocation10_spill] sm:$0xff] %v1505_v23  ;;  %v1567_v30 = vmul.f32 %v1505_v23, %v1505_v23 }
  0xc7   :  { %v1345_v7 = vpop.xlane.xlu1 %148  ;;  %2171 = vst [vmem:[#allocation13_spill] sm:$0xff] %v1516_v31 }
  0xc8   :  { %v1347_v2 = vpop.xlane.xlu0 %145  ;;  %v1527_v36 = vmul.f32 0.00390625, %v1345_v7  ;;  %v1546_v7 = vmul.f32 %v1479_v24, %v1479_v24  ;;  %v1578_v24 = vmul.f32 %v1516_v31, %v1516_v31 }
  0xc9   :  { %v1540_v59 = vmul.f32 0.00390625, %v1347_v2 }
  0xca   :  { %2172 = vst [vmem:[#allocation14_spill] sm:$0xff] %v1527_v36  ;;  %v1587_v42 = vmul.f32 %v1527_v36, %v1527_v36 }
  0xcb   :  { %v1349_v10 = vpop.xlane.xlu1 %154  ;;  %2173 = vst [vmem:[#allocation64_spill] sm:$0xff] %v1540_v59  ;;  %v1595_v14 = vmul.f32 %v1540_v59, %v1540_v59 }
  0xcc   :  { %v1351_v63 = vpop.xlane.xlu0 %151  ;;  %v1553_v3 = vmul.f32 0.00390625, %v1349_v10  ;;  %v2197_v10 = vld [vmem:[#allocation51_spill] sm:$0xff] }
  0xcd   :  { %2158 = vst [vmem:[#allocation55_spill] sm:$0xff] %v1351_v63  ;;  %v1370_v63 = vmul.f32 0.00390625, %v107_v47 }
  0xce   :  { %2174 = vst [vmem:[#allocation65_spill] sm:$0xff] %v1553_v3  ;;  %v1605_v36 = vmul.f32 %v1553_v3, %v1553_v3 }
  0xcf   :  { %v1362_v54 = vpop.xlane.xlu1 %160  ;;  %v1428_v62 = vmul.f32 %v1370_v63, %v1370_v63 }
  0xd0   :  { %2161 = vst [vmem:[#allocation58_spill] sm:$0xff] %v1362_v54  ;;  %v1366_v28 = vpop.xlane.xlu0 %157  ;;  %v1380_v54 = vmul.f32 0.00390625, %v104_v9  ;;  %v1418_v9 = vmul.f32 %v1364_v51, %v1364_v51  ;;  %2189 = vst [vmem:[#allocation67_spill] sm:$0xff] %v1605_v36 }
  0xd2   :  { %v1440_v52 = vmul.f32 %v1380_v54, %v1380_v54 }
  0xd3   :  { %v1392_v60 = vpop.xlane.xlu1 %166 }
  0xd4   :  { %v1404_v47 = vpop.xlane.xlu0 %163  ;;  %v2180_v29 = vld [vmem:[#allocation55_spill] sm:$0xff] }
  0xd5   :  { %v1574_v15 = vmul.f32 0.00390625, %v2180_v29 }
  0xd7   :  { %v1436_v55 = vpop.xlane.xlu1 %172  ;;  %2181 = vst [vmem:[#allocation55_spill] sm:$0xff] %v1574_v15  ;;  %v2183_v43 = vld [vmem:[#allocation58_spill] sm:$0xff]  ;;  %v1614_v20 = vmul.f32 %v1574_v15, %v1574_v15 }
  0xd8   :  { %v1448_v40 = vpop.xlane.xlu0 %169  ;;  %v1583_v2 = vmul.f32 0.00390625, %v2183_v43 }
  0xd9   :  { %2192 = vst [vmem:[#allocation68_spill] sm:$0xff] %v1614_v20 }
  0xda   :  { %2184 = vst [vmem:[#allocation58_spill] sm:$0xff] %v1583_v2 }
  0xdb   :  { %v1481_v21 = vpop.xlane.xlu1 %178 }
  0xdc   :  { %v1494_v27 = vpop.xlane.xlu0 %175 }
  0xdf   :  { %v1529_v16 = vpop.xlane.xlu1 %184 }
  0xe0   :  { %v1542_v39 = vpop.xlane.xlu0 %181 }
  0xe3   :  { %v255_v44 = vpop.xlane.xlu1 %254 }
  0xe4   :  { %v379_v23 = vmul.f32 0.00390625, %v255_v44  ;;  %v252_v33 = vpop.xlane.xlu0 %251  ;;  %v1600_v44 = vmul.f32 0.00390625, %v1366_v28 }
  0xe5   :  { %v378_v31 = vmul.f32 0.00390625, %v252_v33 }
  0xe6   :  { %2188 = vst [vmem:[#allocation66_spill] sm:$0xff] %v1600_v44  ;;  %v443_v37 = vsub.f32 %v379_v23, %v1418_v9  ;;  %v1619_v23 = vmul.f32 0.00390625, %v1392_v60  ;;  %v1630_v9 = vmul.f32 0.00390625, %v1404_v47  ;;  %v1638_v45 = vmul.f32 %v1600_v44, %v1600_v44 }
  0xe7   :  { %v442_v29 = vsub.f32 %v378_v31, %v1396_v50  ;;  %v261_v59 = vpop.xlane.xlu1 %260  ;;  %v1625_v31 = vmul.f32 %v1583_v2, %v1583_v2 }
  0xe8   :  { %v475_v43 = vmax.f32 %v443_v37, 0.0  ;;  %v381_v3 = vmul.f32 0.00390625, %v261_v59  ;;  %v258_v36 = vpop.xlane.xlu0 %257  ;;  %v1649_v2 = vmul.f32 %v1619_v23, %v1619_v23 }
  0xe9   :  { %v474_v48 = vmax.f32 %v442_v29, 0.0  ;;  %v380_v33 = vmul.f32 0.00390625, %v258_v36 }
  0xea   :  { %v508_v60 = vadd.f32 1e-05, %v475_v43  ;;  %v445_v37 = vsub.f32 %v381_v3, %v1408_v11  ;;  %v2198_v11 = vld [vmem:[#allocation52_spill] sm:$0xff] }
  0xeb   :  { %v507_v20 = vadd.f32 1e-05, %v474_v48  ;;  %v444_v29 = vsub.f32 %v380_v33, %v1384_v8  ;;  %v267_v36 = vpop.xlane.xlu1 %266  ;;  %v2199_v8 = vld [vmem:[#allocation53_spill] sm:$0xff]  ;;  %v1662_v33 = vmul.f32 0.00390625, %v1494_v27 }
  0xec   :  { %859 = vrsqrt.f32 %v508_v60  ;;  %v477_v47 = vmax.f32 %v445_v37, 0.0  ;;  %v383_v50 = vmul.f32 0.00390625, %v267_v36  ;;  %v264_v43 = vpop.xlane.xlu0 %263  ;;  %v1652_v60 = vmul.f32 0.00390625, %v1436_v55 }
  0xed   :  { %861 = vrsqrt.f32 %v507_v20  ;;  %v476_v28 = vmax.f32 %v444_v29, 0.0  ;;  %v382_v48 = vmul.f32 0.00390625, %v264_v43  ;;  %v1655_v37 = vmul.f32 0.00390625, %v1448_v40  ;;  %2203 = vst [vmem:[#allocation69_spill] sm:$0xff] %v1662_v33  ;;  %v2204_v40 = vld [vmem:[#allocation54_spill] sm:$0xff] }
  0xee   :  { %v510_v59 = vadd.f32 1e-05, %v477_v47  ;;  %v447_v44 = vsub.f32 %v383_v50, %v1428_v62  ;;  %2200 = vst [vmem:[#allocation51_spill] sm:$0xff] %v1652_v60  ;;  %v1659_v43 = vmul.f32 0.00390625, %v1481_v21  ;;  %v1669_v21 = vmul.f32 %v1630_v9, %v1630_v9 }
  0xef   :  { %2201 = vst [vmem:[#allocation52_spill] sm:$0xff] %v1655_v37  ;;  %v509_v36 = vadd.f32 1e-05, %v476_v28  ;;  %v446_v20 = vsub.f32 %v382_v48, %v1440_v52  ;;  %v273_v29 = vpop.xlane.xlu1 %272  ;;  %v1674_v27 = vmul.f32 %v1652_v60, %v1652_v60 }
  0xf0   :  { %2202 = vst [vmem:[#allocation53_spill] sm:$0xff] %v1659_v43  ;;  %863 = vrsqrt.f32 %v510_v59  ;;  %v479_v47 = vmax.f32 %v447_v44, 0.0  ;;  %v385_v62 = vmul.f32 0.00390625, %v273_v29  ;;  %v270_v50 = vpop.xlane.xlu0 %269 }
  0xf1   :  { %865 = vrsqrt.f32 %v509_v36  ;;  %v478_v55 = vmax.f32 %v446_v20, 0.0  ;;  %v384_v3 = vmul.f32 0.00390625, %v270_v50  ;;  %v1678_v36 = vmul.f32 %v1655_v37, %v1655_v37 }
  0xf2   :  { %v512_v28 = vadd.f32 1e-05, %v479_v47  ;;  %v449_v52 = vsub.f32 %v385_v62, %v1452_v53  ;;  %v1682_v47 = vmul.f32 %v1659_v43, %v1659_v43 }
  0xf3   :  { %v511_v59 = vadd.f32 1e-05, %v478_v55  ;;  %v448_v44 = vsub.f32 %v384_v3, %v1462_v46  ;;  %v279_v48 = vpop.xlane.xlu1 %278  ;;  %v1686_v3 = vmul.f32 %v1662_v33, %v1662_v33  ;;  %v1689_v55 = vmul.f32 0.00390625, %v1529_v16 }
  0xf4   :  { %867 = vrsqrt.f32 %v512_v28  ;;  %v481_v20 = vmax.f32 %v449_v52, 0.0  ;;  %v387_v29 = vmul.f32 0.00390625, %v279_v48  ;;  %v276_v53 = vpop.xlane.xlu0 %275  ;;  %v1692_v28 = vmul.f32 0.00390625, %v1542_v39 }
  0xf5   :  { %869 = vrsqrt.f32 %v511_v59  ;;  %v480_v62 = vmax.f32 %v448_v44, 0.0  ;;  %v386_v46 = vmul.f32 0.00390625, %v276_v53  ;;  %v2205_v59 = vsub.f32 %v2163_v34, %v1364_v51 }
  0xf6   :  { %v860_v50 = vpop.eup %859  ;;  %v514_v52 = vadd.f32 1e-05, %v481_v20  ;;  %v451_v48 = vsub.f32 %v387_v29, %v1472_v0  ;;  %v2206_v53 = vsub.f32 %v2164_v61, %v1364_v51  ;;  %v2207_v39 = vsub.f32 %v2162_v41, %v1355_v57 }
  0xf7   :  { %v862_v15 = vpop.eup %861  ;;  %v637_v44 = vmul.f32 %v860_v50, %v2205_v59  ;;  %v513_v43 = vadd.f32 1e-05, %v480_v62  ;;  %v450_v37 = vsub.f32 %v386_v46, %v1485_v49  ;;  %v285_v16 = vpop.xlane.xlu1 %284  ;;  %v2208_v0 = vsub.f32 %v1025_v4, %v1355_v57  ;;  %v2209_v4 = vld [vmem:[#allocation11_spill] sm:$0xff] }
  0xf8   :  { %v638_v33 = vmul.f32 %v860_v50, %v2206_v53  ;;  %v635_v60 = vmul.f32 %v862_v15, %v2207_v39  ;;  %871 = vrsqrt.f32 %v514_v52  ;;  %v483_v29 = vmax.f32 %v451_v48, 0.0  ;;  %v282_v34 = vpop.xlane.xlu0 %281  ;;  %v2212_v48 = vld [vmem:[#allocation12_spill] sm:$0xff] }
  0xf9   :  { %v636_v20 = vmul.f32 %v862_v15, %v2208_v0  ;;  %v712_v59 = vmul.f32 %v1372_v22, %v637_v44  ;;  %873 = vrsqrt.f32 %v513_v43  ;;  %v482_v61 = vmax.f32 %v450_v37, 0.0  ;;  %v2210_v15 = vld [vmem:[#allocation57_spill] sm:$0xff]  ;;  %v2215_v0 = vld [vmem:[#allocation56_spill] sm:$0xff] }
  0xfa   :  { %v713_v51 = vmul.f32 %v1374_v35, %v638_v33  ;;  %v864_v62 = vpop.eup %863  ;;  %v710_v49 = vmul.f32 %v1372_v22, %v635_v60  ;;  %v516_v41 = vadd.f32 1e-05, %v483_v29  ;;  %v389_v50 = vmul.f32 0.00390625, %v285_v16  ;;  %v2214_v60 = vld [vmem:[#allocation8_spill] sm:$0xff]  ;;  %v2217_v29 = vld [vmem:[#allocation9_spill] sm:$0xff] }
  0xfb   :  { %v711_v46 = vmul.f32 %v1374_v35, %v636_v20  ;;  %v866_v53 = vpop.eup %865  ;;  %776 = vst [vmem:[#allocation5 + $0x10] sm:$0xff] %v712_v59  ;;  %v2211_v57 = vsub.f32 %v2209_v4, %v2210_v15  ;;  %v2213_v44 = vsub.f32 %v2212_v48, %v2210_v15  ;;  %v515_v43 = vadd.f32 1e-05, %v482_v61  ;;  %v291_v39 = vpop.xlane.xlu1 %290 }
  0xfc   :  { %777 = vst [vmem:[#allocation5 + $0x18] sm:$0xff] %v713_v51  ;;  %v388_v37 = vmul.f32 0.00390625, %v282_v34  ;;  %774 = vst [vmem:[#allocation5] sm:$0xff] %v710_v49  ;;  %v2216_v20 = vsub.f32 %v2214_v60, %v2215_v0  ;;  %v2218_v59 = vsub.f32 %v2217_v29, %v2215_v0  ;;  %875 = vrsqrt.f32 %v516_v41  ;;  %v2219_v41 = vld [vmem:[#allocation15_spill] sm:$0xff] }
  0xfd   :  { %v641_v52 = vmul.f32 %v864_v62, %v2211_v57  ;;  %v642_v33 = vmul.f32 %v864_v62, %v2213_v44  ;;  %775 = vst [vmem:[#allocation5 + $0x8] sm:$0xff] %v711_v46  ;;  %v453_v4 = vsub.f32 %v389_v50, %v1498_v17  ;;  %v288_v57 = vpop.xlane.xlu0 %287  ;;  %877 = vrsqrt.f32 %v515_v43 }
  0xfe   :  { %v639_v16 = vmul.f32 %v866_v53, %v2216_v20  ;;  %v640_v51 = vmul.f32 %v866_v53, %v2218_v59  ;;  %v452_v34 = vsub.f32 %v388_v37, %v1509_v58  ;;  %v868_v62 = vpop.eup %867  ;;  %v391_v44 = vmul.f32 0.00390625, %v291_v39  ;;  %v2222_v37 = vld [vmem:[#allocation16_spill] sm:$0xff]  ;;  %v2224_v20 = vld [vmem:[#allocation17_spill] sm:$0xff] }
  0xff   :  { %v716_v15 = vmul.f32 %v1372_v22, %v641_v52  ;;  %v717_v61 = vmul.f32 %v1374_v35, %v642_v33  ;;  %v485_v48 = vmax.f32 %v453_v4, 0.0  ;;  %v870_v60 = vpop.eup %869  ;;  %v2220_v17 = vsub.f32 %v2219_v41, %v1370_v63  ;;  %v297_v43 = vpop.xlane.xlu1 %296 }
 0x100   :  { %v714_v49 = vmul.f32 %v1372_v22, %v639_v16  ;;  %v715_v46 = vmul.f32 %v1374_v35, %v640_v51  ;;  %v2221_v53 = vsub.f32 %v1043_v13, %v1370_v63  ;;  %v484_v33 = vmax.f32 %v452_v34, 0.0 }
 0x101   :  { %780 = vst [vmem:[#allocation5 + $0x30] sm:$0xff] %v716_v15  ;;  %781 = vst [vmem:[#allocation5 + $0x38] sm:$0xff] %v717_v61  ;;  %v645_v50 = vmul.f32 %v868_v62, %v2220_v17  ;;  %v390_v58 = vmul.f32 0.00390625, %v288_v57  ;;  %v2223_v0 = vsub.f32 %v2222_v37, %v1380_v54  ;;  %v2225_v16 = vsub.f32 %v2224_v20, %v1380_v54  ;;  %v294_v4 = vpop.xlane.xlu0 %293  ;;  %v2229_v17 = vld [vmem:[#allocation19_spill] sm:$0xff] }
 0x102   :  { %v646_v52 = vmul.f32 %v868_v62, %v2221_v53  ;;  %778 = vst [vmem:[#allocation5 + $0x20] sm:$0xff] %v714_v49  ;;  %779 = vst [vmem:[#allocation5 + $0x28] sm:$0xff] %v715_v46  ;;  %v518_v59 = vadd.f32 1e-05, %v485_v48  ;;  %v455_v51 = vsub.f32 %v391_v44, %v1520_v18  ;;  %v517_v57 = vadd.f32 1e-05, %v484_v33  ;;  %v872_v61 = vpop.eup %871 }
 0x103   :  { %v643_v39 = vmul.f32 %v870_v60, %v2223_v0  ;;  %v644_v29 = vmul.f32 %v870_v60, %v2225_v16  ;;  %v720_v13 = vmul.f32 %v1372_v22, %v645_v50  ;;  %v454_v15 = vsub.f32 %v390_v58, %v1533_v32  ;;  %v874_v54 = vpop.eup %873  ;;  %v2226_v46 = vld [vmem:[#allocation18_spill] sm:$0xff]  ;;  %v303_v41 = vpop.xlane.xlu1 %302 }
 0x104   :  { %v721_v63 = vmul.f32 %v1374_v35, %v646_v52  ;;  %879 = vrsqrt.f32 %v518_v59  ;;  %v487_v49 = vmax.f32 %v455_v51, 0.0  ;;  %v2227_v18 = vsub.f32 %v2226_v46, %v1390_v56  ;;  %v2231_v52 = vld [vmem:[#allocation20_spill] sm:$0xff] }
 0x105   :  { %v718_v34 = vmul.f32 %v1372_v22, %v643_v39  ;;  %v719_v62 = vmul.f32 %v1374_v35, %v644_v29  ;;  %784 = vst [vmem:[#allocation5 + $0x50] sm:$0xff] %v720_v13  ;;  %v2228_v44 = vsub.f32 %v1055_v19, %v1390_v56  ;;  %881 = vrsqrt.f32 %v517_v57  ;;  %v300_v39 = vpop.xlane.xlu0 %299 }
 0x106   :  { %785 = vst [vmem:[#allocation5 + $0x58] sm:$0xff] %v721_v63  ;;  %v649_v48 = vmul.f32 %v872_v61, %v2227_v18  ;;  %v486_v32 = vmax.f32 %v454_v15, 0.0  ;;  %v2230_v50 = vsub.f32 %v2229_v17, %v1402_v1  ;;  %v2232_v33 = vsub.f32 %v2231_v52, %v1402_v1  ;;  %v876_v29 = vpop.eup %875  ;;  %v2233_v1 = vld [vmem:[#allocation21_spill] sm:$0xff] }
 0x107   :  { %v650_v60 = vmul.f32 %v872_v61, %v2228_v44  ;;  %782 = vst [vmem:[#allocation5 + $0x40] sm:$0xff] %v718_v34  ;;  %783 = vst [vmem:[#allocation5 + $0x48] sm:$0xff] %v719_v62  ;;  %v520_v37 = vadd.f32 1e-05, %v487_v49  ;;  %v393_v0 = vmul.f32 0.00390625, %v297_v43  ;;  %v392_v16 = vmul.f32 0.00390625, %v294_v4  ;;  %v878_v63 = vpop.eup %877  ;;  %v309_v34 = vpop.xlane.xlu1 %308 }
 0x108   :  { %v647_v53 = vmul.f32 %v874_v54, %v2230_v50  ;;  %v648_v58 = vmul.f32 %v874_v54, %v2232_v33  ;;  %v724_v20 = vmul.f32 %v1372_v22, %v649_v48  ;;  %v519_v56 = vadd.f32 1e-05, %v486_v32  ;;  %v2237_v49 = vld [vmem:[#allocation22_spill] sm:$0xff] }
 0x109   :  { %v725_v19 = vmul.f32 %v1374_v35, %v650_v60  ;;  %883 = vrsqrt.f32 %v520_v37  ;;  %v457_v13 = vsub.f32 %v393_v0, %v1546_v7  ;;  %v2234_v43 = vsub.f32 %v2233_v1, %v1414_v5  ;;  %v306_v44 = vpop.xlane.xlu0 %305 }
 0x10a   :  { %v722_v59 = vmul.f32 %v1372_v22, %v647_v53  ;;  %v723_v51 = vmul.f32 %v1374_v35, %v648_v58  ;;  %788 = vst [vmem:[#allocation5 + $0x70] sm:$0xff] %v724_v20  ;;  %v2235_v15 = vsub.f32 %v1067_v25, %v1414_v5  ;;  %885 = vrsqrt.f32 %v519_v56 }
 0x10b   :  { %789 = vst [vmem:[#allocation5 + $0x78] sm:$0xff] %v725_v19  ;;  %v653_v57 = vmul.f32 %v876_v29, %v2234_v43  ;;  %v456_v4 = vsub.f32 %v392_v16, %v1557_v38  ;;  %v2236_v7 = vsub.f32 %v1069_v26, %v1424_v6  ;;  %v2238_v54 = vsub.f32 %v2237_v49, %v1424_v6  ;;  %v315_v33 = vpop.xlane.xlu1 %314  ;;  %v2239_v19 = vld [vmem:[#allocation23_spill] sm:$0xff] }
 0x10c   :  { %v654_v61 = vmul.f32 %v876_v29, %v2235_v15  ;;  %786 = vst [vmem:[#allocation5 + $0x60] sm:$0xff] %v722_v59  ;;  %787 = vst [vmem:[#allocation5 + $0x68] sm:$0xff] %v723_v51  ;;  %v489_v18 = vmax.f32 %v457_v13, 0.0  ;;  %v395_v48 = vmul.f32 0.00390625, %v303_v41  ;;  %v394_v38 = vmul.f32 0.00390625, %v300_v39  ;;  %v2243_v13 = vld [vmem:[#allocation25_spill] sm:$0xff] }
 0x10d   :  { %v651_v62 = vmul.f32 %v878_v63, %v2236_v7  ;;  %v652_v46 = vmul.f32 %v878_v63, %v2238_v54  ;;  %v728_v5 = vmul.f32 %v1372_v22, %v653_v57  ;;  %v488_v60 = vmax.f32 %v456_v4, 0.0  ;;  %v312_v39 = vpop.xlane.xlu0 %311  ;;  %v2244_v63 = vld [vmem:[#allocation59_spill] sm:$0xff]  ;;  %v2246_v57 = vld [vmem:[#allocation26_spill] sm:$0xff] }
 0x10e   :  { %v729_v25 = vmul.f32 %v1374_v35, %v654_v61  ;;  %v522_v50 = vadd.f32 1e-05, %v489_v18  ;;  %v459_v26 = vsub.f32 %v395_v48, %v1567_v30  ;;  %v458_v53 = vsub.f32 %v394_v38, %v1578_v24  ;;  %v880_v58 = vpop.eup %879  ;;  %v2241_v24 = vld [vmem:[#allocation24_spill] sm:$0xff] }
 0x10f   :  { %v726_v32 = vmul.f32 %v1372_v22, %v651_v62  ;;  %v727_v17 = vmul.f32 %v1374_v35, %v652_v46  ;;  %792 = vst [vmem:[#allocation5 + $0x90] sm:$0xff] %v728_v5  ;;  %v521_v6 = vadd.f32 1e-05, %v488_v60  ;;  %v397_v41 = vmul.f32 0.00390625, %v309_v34  ;;  %v882_v30 = vpop.eup %881  ;;  %v321_v54 = vpop.xlane.xlu1 %320  ;;  %v2249_v60 = vld [vmem:[#allocation60_spill] sm:$0xff] }
 0x110   :  { %793 = vst [vmem:[#allocation5 + $0x98] sm:$0xff] %v729_v25  ;;  %v396_v52 = vmul.f32 0.00390625, %v306_v44  ;;  %887 = vrsqrt.f32 %v522_v50  ;;  %v491_v37 = vmax.f32 %v459_v26, 0.0  ;;  %v399_v0 = vmul.f32 0.00390625, %v315_v33  ;;  %v2256_v33 = vld [vmem:[#allocation30_spill] sm:$0xff] }
 0x111   :  { %790 = vst [vmem:[#allocation5 + $0x80] sm:$0xff] %v726_v32  ;;  %791 = vst [vmem:[#allocation5 + $0x88] sm:$0xff] %v727_v17  ;;  %v1786_v20 = vmul.f32 %v1689_v55, %v1689_v55  ;;  %v2240_v56 = vsub.f32 %v2239_v19, %v1434_v12  ;;  %v2242_v29 = vsub.f32 %v2241_v24, %v1434_v12  ;;  %889 = vrsqrt.f32 %v521_v6  ;;  %v318_v5 = vpop.xlane.xlu0 %317  ;;  %v2251_v17 = vld [vmem:[#allocation28_spill] sm:$0xff]  ;;  %v2253_v6 = vld [vmem:[#allocation29_spill] sm:$0xff] }
 0x112   :  { %v490_v51 = vmax.f32 %v458_v53, 0.0  ;;  %v2245_v1 = vsub.f32 %v2243_v13, %v2244_v63  ;;  %v2247_v15 = vsub.f32 %v2246_v57, %v2244_v63  ;;  %v524_v4 = vadd.f32 1e-05, %v491_v37  ;;  %v2254_v53 = vld [vmem:[#allocation61_spill] sm:$0xff]  ;;  %v2258_v19 = vld [vmem:[#allocation67_spill] sm:$0xff]  ;;  %v2259_v57 = vld [vmem:[#allocation68_spill] sm:$0xff] }
 0x113   :  { %v657_v16 = vmul.f32 %v880_v58, %v2240_v56  ;;  %v658_v59 = vmul.f32 %v880_v58, %v2242_v29  ;;  %v461_v34 = vsub.f32 %v397_v41, %v1587_v42  ;;  %v460_v12 = vsub.f32 %v396_v52, %v1595_v14  ;;  %v884_v46 = vpop.eup %883  ;;  %v2248_v42 = vld [vmem:[#allocation27_spill] sm:$0xff] }
 0x114   :  { %v655_v43 = vmul.f32 %v882_v30, %v2245_v1  ;;  %v656_v61 = vmul.f32 %v882_v30, %v2247_v15  ;;  %v523_v49 = vadd.f32 1e-05, %v490_v51  ;;  %891 = vrsqrt.f32 %v524_v4  ;;  %v886_v25 = vpop.eup %885  ;;  %v327_v51 = vpop.xlane.xlu1 %326 }
 0x115   :  { %v732_v7 = vmul.f32 %v1372_v22, %v657_v16  ;;  %v733_v62 = vmul.f32 %v1374_v35, %v658_v59  ;;  %v493_v44 = vmax.f32 %v461_v34, 0.0  ;;  %v2250_v38 = vsub.f32 %v2248_v42, %v2249_v60 }
 0x116   :  { %v730_v18 = vmul.f32 %v1372_v22, %v655_v43  ;;  %v731_v48 = vmul.f32 %v1374_v35, %v656_v61  ;;  %v2252_v50 = vsub.f32 %v2251_v17, %v2249_v60  ;;  %893 = vrsqrt.f32 %v523_v49  ;;  %v324_v43 = vpop.xlane.xlu0 %323 }
 0x117   :  { %796 = vst [vmem:[#allocation5 + $0xb0] sm:$0xff] %v732_v7  ;;  %797 = vst [vmem:[#allocation5 + $0xb8] sm:$0xff] %v733_v62  ;;  %v661_v32 = vmul.f32 %v884_v46, %v2250_v38  ;;  %v492_v26 = vmax.f32 %v460_v12, 0.0  ;;  %v2255_v41 = vsub.f32 %v2253_v6, %v2254_v53  ;;  %v2257_v58 = vsub.f32 %v2256_v33, %v2254_v53  ;;  %v2260_v12 = vld [vmem:[#allocation31_spill] sm:$0xff]  ;;  %v2265_v38 = vld [vmem:[#allocation33_spill] sm:$0xff] }
 0x118   :  { %v662_v14 = vmul.f32 %v884_v46, %v2252_v50  ;;  %794 = vst [vmem:[#allocation5 + $0xa0] sm:$0xff] %v730_v18  ;;  %795 = vst [vmem:[#allocation5 + $0xa8] sm:$0xff] %v731_v48  ;;  %v526_v30 = vadd.f32 1e-05, %v493_v44  ;;  %v463_v56 = vsub.f32 %v399_v0, %v2258_v19  ;;  %v398_v59 = vmul.f32 0.00390625, %v312_v39  ;;  %v2261_v46 = vld [vmem:[#allocation62_spill] sm:$0xff]  ;;  %v333_v60 = vpop.xlane.xlu1 %332 }
 0x119   :  { %v659_v52 = vmul.f32 %v886_v25, %v2255_v41  ;;  %v660_v37 = vmul.f32 %v886_v25, %v2257_v58  ;;  %v736_v16 = vmul.f32 %v1372_v22, %v661_v32  ;;  %v525_v29 = vadd.f32 1e-05, %v492_v26  ;;  %v2263_v44 = vld [vmem:[#allocation32_spill] sm:$0xff]  ;;  %v2266_v32 = vld [vmem:[#allocation63_spill] sm:$0xff] }
 0x11a   :  { %v737_v24 = vmul.f32 %v1374_v35, %v662_v14  ;;  %895 = vrsqrt.f32 %v526_v30  ;;  %v495_v1 = vmax.f32 %v463_v56, 0.0  ;;  %v462_v15 = vsub.f32 %v398_v59, %v2259_v57  ;;  %v888_v4 = vpop.eup %887  ;;  %v2268_v14 = vld [vmem:[#allocation34_spill] sm:$0xff]  ;;  %v330_v41 = vpop.xlane.xlu0 %329 }
 0x11b   :  { %v734_v13 = vmul.f32 %v1372_v22, %v659_v52  ;;  %v735_v63 = vmul.f32 %v1374_v35, %v660_v37  ;;  %800 = vst [vmem:[#allocation5 + $0xd0] sm:$0xff] %v736_v16  ;;  %897 = vrsqrt.f32 %v525_v29  ;;  %v401_v0 = vmul.f32 0.00390625, %v321_v54  ;;  %v890_v49 = vpop.eup %889  ;;  %v2270_v29 = vld [vmem:[#allocation35_spill] sm:$0xff] }
 0x11c   :  { %801 = vst [vmem:[#allocation5 + $0xd8] sm:$0xff] %v737_v24  ;;  %v400_v61 = vmul.f32 0.00390625, %v318_v5  ;;  %v528_v34 = vadd.f32 1e-05, %v495_v1  ;;  %v403_v39 = vmul.f32 0.00390625, %v327_v51  ;;  %v402_v7 = vmul.f32 0.00390625, %v324_v43  ;;  %v339_v57 = vpop.xlane.xlu1 %338 }
 0x11d   :  { %798 = vst [vmem:[#allocation5 + $0xc0] sm:$0xff] %v734_v13  ;;  %799 = vst [vmem:[#allocation5 + $0xc8] sm:$0xff] %v735_v63  ;;  %v1826_v62 = vmul.f32 %v1692_v28, %v1692_v28  ;;  %v2262_v18 = vsub.f32 %v2260_v12, %v2261_v46  ;;  %v2264_v25 = vsub.f32 %v2263_v44, %v2261_v46  ;;  %v494_v5 = vmax.f32 %v462_v15, 0.0  ;;  %v2273_v13 = vld [vmem:[#allocation36_spill] sm:$0xff]  ;;  %v2275_v15 = vld [vmem:[#allocation37_spill] sm:$0xff] }
 0x11e   :  { %v465_v42 = vsub.f32 %v401_v0, %v1625_v31  ;;  %v2267_v17 = vsub.f32 %v2265_v38, %v2266_v32  ;;  %v2269_v26 = vsub.f32 %v2268_v14, %v2266_v32  ;;  %899 = vrsqrt.f32 %v528_v34  ;;  %v892_v31 = vpop.eup %891  ;;  %v2276_v0 = vld [vmem:[#allocation13_spill] sm:$0xff]  ;;  %v336_v46 = vpop.xlane.xlu0 %335  ;;  %v2280_v32 = vld [vmem:[#allocation39_spill] sm:$0xff] }
 0x11f   :  { %v665_v48 = vmul.f32 %v888_v4, %v2262_v18  ;;  %v666_v54 = vmul.f32 %v888_v4, %v2264_v25  ;;  %v464_v53 = vsub.f32 %v400_v61, %v1638_v45  ;;  %v527_v58 = vadd.f32 1e-05, %v494_v5  ;;  %v2271_v45 = vld [vmem:[#allocation10_spill] sm:$0xff] }
 0x120   :  { %v663_v50 = vmul.f32 %v890_v49, %v2267_v17  ;;  %v664_v6 = vmul.f32 %v890_v49, %v2269_v26  ;;  %v497_v37 = vmax.f32 %v465_v42, 0.0  ;;  %v467_v16 = vsub.f32 %v403_v39, %v1649_v2  ;;  %v894_v24 = vpop.eup %893  ;;  %v2278_v4 = vld [vmem:[#allocation38_spill] sm:$0xff]  ;;  %v2283_v26 = vld [vmem:[#allocation40_spill] sm:$0xff] }
 0x121   :  { %v740_v52 = vmul.f32 %v1372_v22, %v665_v48  ;;  %v741_v33 = vmul.f32 %v1374_v35, %v666_v54  ;;  %v496_v56 = vmax.f32 %v464_v53, 0.0  ;;  %v2272_v59 = vsub.f32 %v2270_v29, %v2271_v45  ;;  %v2281_v17 = vld [vmem:[#allocation14_spill] sm:$0xff] }
 0x122   :  { %v738_v30 = vmul.f32 %v1372_v22, %v663_v50  ;;  %v739_v19 = vmul.f32 %v1374_v35, %v664_v6  ;;  %v2274_v63 = vsub.f32 %v2273_v13, %v2271_v45  ;;  %901 = vrsqrt.f32 %v527_v58 }
 0x123   :  { %804 = vst [vmem:[#allocation5 + $0xf0] sm:$0xff] %v740_v52  ;;  %805 = vst [vmem:[#allocation5 + $0xf8] sm:$0xff] %v741_v33  ;;  %v669_v51 = vmul.f32 %v892_v31, %v2272_v59  ;;  %v530_v43 = vadd.f32 1e-05, %v497_v37  ;;  %v2277_v61 = vsub.f32 %v2275_v15, %v2276_v0  ;;  %v2279_v34 = vsub.f32 %v2278_v4, %v2276_v0  ;;  %v2286_v33 = vld [vmem:[#allocation64_spill] sm:$0xff]  ;;  %v2291_v15 = vld [vmem:[#allocation65_spill] sm:$0xff] }
 0x124   :  { %v670_v1 = vmul.f32 %v892_v31, %v2274_v63  ;;  %802 = vst [vmem:[#allocation5 + $0xe0] sm:$0xff] %v738_v30  ;;  %803 = vst [vmem:[#allocation5 + $0xe8] sm:$0xff] %v739_v19  ;;  %v529_v49 = vadd.f32 1e-05, %v496_v56  ;;  %v499_v12 = vmax.f32 %v467_v16, 0.0  ;;  %v466_v44 = vsub.f32 %v402_v7, %v1669_v21  ;;  %v896_v25 = vpop.eup %895  ;;  %v2285_v7 = vld [vmem:[#allocation41_spill] sm:$0xff] }
 0x125   :  { %v667_v2 = vmul.f32 %v894_v24, %v2277_v61  ;;  %v668_v39 = vmul.f32 %v894_v24, %v2279_v34  ;;  %v744_v18 = vmul.f32 %v1372_v22, %v669_v51  ;;  %903 = vrsqrt.f32 %v530_v43  ;;  %v898_v38 = vpop.eup %897  ;;  %v2288_v31 = vld [vmem:[#allocation42_spill] sm:$0xff]  ;;  %v342_v43 = vpop.xlane.xlu0 %341 }
 0x126   :  { %v745_v48 = vmul.f32 %v1374_v35, %v670_v1  ;;  %905 = vrsqrt.f32 %v529_v49  ;;  %v532_v42 = vadd.f32 1e-05, %v499_v12  ;;  %v2282_v50 = vsub.f32 %v2280_v32, %v2281_v17  ;;  %v2298_v32 = vld [vmem:[#allocation46_spill] sm:$0xff] }
 0x127   :  { %v742_v54 = vmul.f32 %v1372_v22, %v667_v2  ;;  %v743_v5 = vmul.f32 %v1374_v35, %v668_v39  ;;  %808 = vst [vmem:[#allocation5 + $0x110] sm:$0xff] %v744_v18  ;;  %v2284_v6 = vsub.f32 %v2283_v26, %v2281_v17  ;;  %v498_v52 = vmax.f32 %v466_v44, 0.0  ;;  %v2293_v2 = vld [vmem:[#allocation44_spill] sm:$0xff] }
 0x128   :  { %809 = vst [vmem:[#allocation5 + $0x118] sm:$0xff] %v745_v48  ;;  %v673_v14 = vmul.f32 %v896_v25, %v2282_v50  ;;  %v405_v21 = vmul.f32 0.00390625, %v333_v60  ;;  %v2287_v58 = vsub.f32 %v2285_v7, %v2286_v33  ;;  %v2289_v30 = vsub.f32 %v2288_v31, %v2286_v33  ;;  %v345_v60 = vpop.xlane.xlu1 %344  ;;  %v900_v59 = vpop.eup %899  ;;  %v2300_v33 = vld [vmem:[#allocation47_spill] sm:$0xff] }
 0x129   :  { %v674_v53 = vmul.f32 %v896_v25, %v2284_v6  ;;  %806 = vst [vmem:[#allocation5 + $0x100] sm:$0xff] %v742_v54  ;;  %807 = vst [vmem:[#allocation5 + $0x108] sm:$0xff] %v743_v5  ;;  %907 = vrsqrt.f32 %v532_v42  ;;  %v404_v56 = vmul.f32 0.00390625, %v330_v41  ;;  %v531_v29 = vadd.f32 1e-05, %v498_v52  ;;  %v2290_v41 = vld [vmem:[#allocation43_spill] sm:$0xff] }
 0x12a   :  { %v671_v37 = vmul.f32 %v898_v38, %v2287_v58  ;;  %v672_v19 = vmul.f32 %v898_v38, %v2289_v30  ;;  %v748_v16 = vmul.f32 %v1372_v22, %v673_v14  ;;  %v469_v45 = vsub.f32 %v405_v21, %v1674_v27  ;;  %v2295_v54 = vld [vmem:[#allocation45_spill] sm:$0xff]  ;;  %v2296_v5 = vld [vmem:[#allocation55_spill] sm:$0xff]  ;;  %v2301_v58 = vld [vmem:[#allocation58_spill] sm:$0xff] }
 0x12b   :  { %v749_v24 = vmul.f32 %v1374_v35, %v674_v53  ;;  %v468_v63 = vsub.f32 %v404_v56, %v1678_v36  ;;  %v407_v1 = vmul.f32 0.00390625, %v339_v57  ;;  %v2292_v0 = vsub.f32 %v2290_v41, %v2291_v15  ;;  %v2303_v30 = vld [vmem:[#allocation48_spill] sm:$0xff] }
 0x12c   :  { %v746_v51 = vmul.f32 %v1372_v22, %v671_v37  ;;  %v747_v13 = vmul.f32 %v1374_v35, %v672_v19  ;;  %812 = vst [vmem:[#allocation5 + $0x130] sm:$0xff] %v748_v16  ;;  %v2294_v4 = vsub.f32 %v2293_v2, %v2291_v15  ;;  %909 = vrsqrt.f32 %v531_v29  ;;  %v902_v12 = vpop.eup %901  ;;  %v2305_v16 = vld [vmem:[#allocation49_spill] sm:$0xff] }
 0x12d   :  { %813 = vst [vmem:[#allocation5 + $0x138] sm:$0xff] %v749_v24  ;;  %v677_v61 = vmul.f32 %v900_v59, %v2292_v0  ;;  %v501_v34 = vmax.f32 %v469_v45, 0.0  ;;  %v500_v39 = vmax.f32 %v468_v63, 0.0  ;;  %v471_v49 = vsub.f32 %v407_v1, %v1682_v47  ;;  %v2306_v24 = vld [vmem:[#allocation66_spill] sm:$0xff] }
 0x12e   :  { %v678_v27 = vmul.f32 %v900_v59, %v2294_v4  ;;  %810 = vst [vmem:[#allocation5 + $0x120] sm:$0xff] %v746_v51  ;;  %811 = vst [vmem:[#allocation5 + $0x128] sm:$0xff] %v747_v13  ;;  %v406_v36 = vmul.f32 0.00390625, %v336_v46  ;;  %v409_v57 = vmul.f32 0.00390625, %v345_v60  ;;  %v408_v25 = vmul.f32 0.00390625, %v342_v43 }
 0x12f   :  { %v752_v18 = vmul.f32 %v1372_v22, %v677_v61  ;;  %v534_v44 = vadd.f32 1e-05, %v501_v34  ;;  %v2297_v42 = vsub.f32 %v2295_v54, %v2296_v5  ;;  %v2299_v17 = vsub.f32 %v2298_v32, %v2296_v5  ;;  %v904_v47 = vpop.eup %903  ;;  %v926_v32 = vld [vmem:[#allocation2 + $0x1a8] sm:$0xff] }
 0x130   :  { %v753_v48 = vmul.f32 %v1374_v35, %v678_v27  ;;  %v533_v14 = vadd.f32 1e-05, %v500_v39  ;;  %v503_v26 = vmax.f32 %v471_v49, 0.0  ;;  %v470_v46 = vsub.f32 %v406_v36, %v1686_v3  ;;  %v906_v52 = vpop.eup %905 }
 0x131   :  { %v675_v38 = vmul.f32 %v902_v12, %v2297_v42  ;;  %v676_v50 = vmul.f32 %v902_v12, %v2299_v17  ;;  %816 = vst [vmem:[#allocation5 + $0x150] sm:$0xff] %v752_v18  ;;  %911 = vrsqrt.f32 %v534_v44  ;;  %v473_v6 = vsub.f32 %v409_v57, %v1786_v20  ;;  %v2308_v20 = vld [vmem:[#allocation50_spill] sm:$0xff] }
 0x132   :  { %817 = vst [vmem:[#allocation5 + $0x158] sm:$0xff] %v753_v48  ;;  %v472_v53 = vsub.f32 %v408_v25, %v1826_v62  ;;  %v2302_v37 = vsub.f32 %v2300_v33, %v2301_v58  ;;  %v2304_v19 = vsub.f32 %v2303_v30, %v2301_v58  ;;  %v2307_v3 = vsub.f32 %v2305_v16, %v2306_v24  ;;  %v923_v18 = vld [vmem:[#allocation2 + $0x1b0] sm:$0xff]  ;;  %v2314_v48 = vld [vmem:[#allocation51_spill] sm:$0xff] }
 0x133   :  { %v750_v21 = vmul.f32 %v1372_v22, %v675_v38  ;;  %v751_v7 = vmul.f32 %v1374_v35, %v676_v50  ;;  %v2309_v62 = vsub.f32 %v2308_v20, %v2306_v24  ;;  %913 = vrsqrt.f32 %v533_v14  ;;  %v908_v59 = vpop.eup %907  ;;  %v924_v25 = vld [vmem:[#allocation2 + $0x1b8] sm:$0xff]  ;;  %v925_v38 = vld [vmem:[#allocation2 + $0x1a0] sm:$0xff]  ;;  %v930_v24 = vld [vmem:[#allocation2 + $0x1c8] sm:$0xff] }
 0x134   :  { %v681_v31 = vmul.f32 %v904_v47, %v2302_v37  ;;  %v682_v56 = vmul.f32 %v904_v47, %v2304_v19  ;;  %v679_v29 = vmul.f32 %v906_v52, %v2307_v3  ;;  %v536_v60 = vadd.f32 1e-05, %v503_v26  ;;  %v928_v33 = vld [vmem:[#allocation2 + $0x1d8] sm:$0xff]  ;;  %v929_v19 = vld [vmem:[#allocation2 + $0x1c0] sm:$0xff] }
 0x135   :  { %v680_v45 = vmul.f32 %v906_v52, %v2309_v62  ;;  %814 = vst [vmem:[#allocation5 + $0x140] sm:$0xff] %v750_v21  ;;  %815 = vst [vmem:[#allocation5 + $0x148] sm:$0xff] %v751_v7  ;;  %v502_v63 = vmax.f32 %v470_v46, 0.0  ;;  %v505_v1 = vmax.f32 %v473_v6, 0.0  ;;  %v2310_v15 = vsub.f32 %v2197_v10, %v1619_v23  ;;  %v927_v52 = vld [vmem:[#allocation2 + $0x1d0] sm:$0xff]  ;;  %v2316_v21 = vld [vmem:[#allocation53_spill] sm:$0xff] }
 0x136   :  { %v756_v51 = vmul.f32 %v1372_v22, %v681_v31  ;;  %v757_v13 = vmul.f32 %v1374_v35, %v682_v56  ;;  %v754_v43 = vmul.f32 %v1372_v22, %v679_v29  ;;  %v2311_v61 = vsub.f32 %v2198_v11, %v1619_v23  ;;  %v910_v39 = vpop.eup %909  ;;  %v2317_v56 = vld [vmem:[#allocation69_spill] sm:$0xff] }
 0x137   :  { %v755_v41 = vmul.f32 %v1374_v35, %v680_v45  ;;  %v685_v0 = vmul.f32 %v908_v59, %v2310_v15  ;;  %915 = vrsqrt.f32 %v536_v60  ;;  %v535_v4 = vadd.f32 1e-05, %v502_v63  ;;  %v931_v45 = vld [vmem:[#allocation2 + $0x1f0] sm:$0xff] }
 0x138   :  { %v686_v2 = vmul.f32 %v908_v59, %v2311_v61  ;;  %820 = vst [vmem:[#allocation5 + $0x170] sm:$0xff] %v756_v51  ;;  %821 = vst [vmem:[#allocation5 + $0x178] sm:$0xff] %v757_v13  ;;  %v538_v27 = vadd.f32 1e-05, %v505_v1  ;;  %v504_v34 = vmax.f32 %v472_v53, 0.0  ;;  %v2312_v10 = vsub.f32 %v2199_v8, %v1630_v9  ;;  %v932_v59 = vld [vmem:[#allocation2 + $0x1f8] sm:$0xff] }
 0x139   :  { %818 = vst [vmem:[#allocation5 + $0x160] sm:$0xff] %v754_v43  ;;  %819 = vst [vmem:[#allocation5 + $0x168] sm:$0xff] %v755_v41  ;;  %v760_v49 = vmul.f32 %v1372_v22, %v685_v0  ;;  %v2313_v23 = vsub.f32 %v2204_v40, %v1630_v9  ;;  %917 = vrsqrt.f32 %v535_v4  ;;  %v625_v44 = vsub.f32 %v923_v18, %v2314_v48  ;;  %v2315_v9 = vld [vmem:[#allocation52_spill] sm:$0xff]  ;;  %v934_v1 = vld [vmem:[#allocation2 + $0x1e8] sm:$0xff] }
 0x13a   :  { %v761_v36 = vmul.f32 %v1374_v35, %v686_v2  ;;  %v683_v57 = vmul.f32 %v910_v39, %v2312_v10  ;;  %v537_v12 = vadd.f32 1e-05, %v504_v34  ;;  %919 = vrsqrt.f32 %v538_v27  ;;  %v933_v13 = vld [vmem:[#allocation2 + $0x1e0] sm:$0xff] }
 0x13b   :  { %v684_v11 = vmul.f32 %v910_v39, %v2313_v23  ;;  %824 = vst [vmem:[#allocation5 + $0x190] sm:$0xff] %v760_v49  ;;  %v626_v54 = vsub.f32 %v924_v25, %v2314_v48  ;;  %v912_v42 = vpop.eup %911  ;;  %v623_v40 = vsub.f32 %v925_v38, %v2315_v9  ;;  %v624_v17 = vsub.f32 %v926_v32, %v2315_v9 }
 0x13c   :  { %825 = vst [vmem:[#allocation5 + $0x198] sm:$0xff] %v761_v36  ;;  %v758_v5 = vmul.f32 %v1372_v22, %v683_v57  ;;  %921 = vrsqrt.f32 %v537_v12  ;;  %v689_v50 = vmul.f32 %v912_v42, %v625_v44  ;;  %v629_v7 = vsub.f32 %v927_v52, %v2316_v21 }
 0x13d   :  { %v759_v8 = vmul.f32 %v1374_v35, %v684_v11  ;;  %v690_v14 = vmul.f32 %v912_v42, %v626_v54  ;;  %v914_v26 = vpop.eup %913  ;;  %v630_v58 = vsub.f32 %v928_v33, %v2316_v21  ;;  %v627_v16 = vsub.f32 %v929_v19, %v2317_v56 }
 0x13e   :  { %822 = vst [vmem:[#allocation5 + $0x180] sm:$0xff] %v758_v5  ;;  %v764_v47 = vmul.f32 %v1372_v22, %v689_v50  ;;  %v687_v6 = vmul.f32 %v914_v26, %v623_v40  ;;  %v688_v53 = vmul.f32 %v914_v26, %v624_v17  ;;  %v628_v3 = vsub.f32 %v930_v24, %v2317_v56 }
 0x13f   :  { %823 = vst [vmem:[#allocation5 + $0x188] sm:$0xff] %v759_v8  ;;  %v765_v46 = vmul.f32 %v1374_v35, %v690_v14  ;;  %v633_v60 = vsub.f32 %v931_v45, %v1689_v55  ;;  %v634_v51 = vsub.f32 %v932_v59, %v1689_v55  ;;  %v631_v63 = vsub.f32 %v933_v13, %v1692_v28 }
 0x140   :  { %828 = vst [vmem:[#allocation5 + $0x1b0] sm:$0xff] %v764_v47  ;;  %v762_v31 = vmul.f32 %v1372_v22, %v687_v6  ;;  %v763_v30 = vmul.f32 %v1374_v35, %v688_v53  ;;  %v632_v43 = vsub.f32 %v934_v1, %v1692_v28 }
 0x141   :  { %v916_v37 = vpop.eup %915  ;;  %829 = vst [vmem:[#allocation5 + $0x1b8] sm:$0xff] %v765_v46 }
 0x142   :  { %v693_v29 = vmul.f32 %v916_v37, %v629_v7  ;;  %v694_v20 = vmul.f32 %v916_v37, %v630_v58  ;;  %826 = vst [vmem:[#allocation5 + $0x1a0] sm:$0xff] %v762_v31  ;;  %827 = vst [vmem:[#allocation5 + $0x1a8] sm:$0xff] %v763_v30 }
 0x143   :  { %v918_v62 = vpop.eup %917 }
 0x144   :  { %v920_v41 = vpop.eup %919  ;;  %v768_v15 = vmul.f32 %v1372_v22, %v693_v29  ;;  %v769_v0 = vmul.f32 %v1374_v35, %v694_v20  ;;  %v691_v61 = vmul.f32 %v918_v62, %v627_v16  ;;  %v692_v2 = vmul.f32 %v918_v62, %v628_v3 }
 0x145   :  { %v697_v27 = vmul.f32 %v920_v41, %v633_v60  ;;  %v698_v34 = vmul.f32 %v920_v41, %v634_v51 }
 0x146   :  { %v922_v4 = vpop.eup %921  ;;  %832 = vst [vmem:[#allocation5 + $0x1d0] sm:$0xff] %v768_v15  ;;  %833 = vst [vmem:[#allocation5 + $0x1d8] sm:$0xff] %v769_v0  ;;  %v766_v55 = vmul.f32 %v1372_v22, %v691_v61  ;;  %v767_v28 = vmul.f32 %v1374_v35, %v692_v2 }
 0x147   :  { %v695_v39 = vmul.f32 %v922_v4, %v631_v63  ;;  %v696_v49 = vmul.f32 %v922_v4, %v632_v43  ;;  %v772_v36 = vmul.f32 %v1372_v22, %v697_v27  ;;  %v773_v10 = vmul.f32 %v1374_v35, %v698_v34 }
 0x148   :  { %830 = vst [vmem:[#allocation5 + $0x1c0] sm:$0xff] %v766_v55  ;;  %831 = vst [vmem:[#allocation5 + $0x1c8] sm:$0xff] %v767_v28 }
 0x149   :  { %v770_v57 = vmul.f32 %v1372_v22, %v695_v39  ;;  %v771_v23 = vmul.f32 %v1374_v35, %v696_v49  ;;  %836 = vst [vmem:[#allocation5 + $0x1f0] sm:$0xff] %v772_v36  ;;  %837 = vst [vmem:[#allocation5 + $0x1f8] sm:$0xff] %v773_v10 }
 0x14b   :  { %834 = vst [vmem:[#allocation5 + $0x1e0] sm:$0xff] %v770_v57  ;;  %835 = vst [vmem:[#allocation5 + $0x1e8] sm:$0xff] %v771_v23 }
 0x14c   :  { %968 = shalt.err (!%p965_p12)
}
 0x14d   :  { %s969_s28 = scalar_lea.hbm %s1975_s2, 8192 }
 0x14e   :  { %p970_p13 = scmp.ne.s32.totalorder %s1975_s2, %s969_s28  ;;  %p973_p0 = scmp.lt.u32.totalorder %s969_s28, %s1975_s2 }
 0x150   :  { %p975_p1 = pnand %p973_p0, %p970_p13 }
 0x152   :  { %978 = shalt.err (!%p975_p1)
}
 0x153   :  { %849 = dma.vmem_to_hbm [thread:$0]  %s844_s24, 8192, %s1975_s2, [#allocation4], %s984_s19, %s984_s19, %s985_s20  }
 0x154   :  { %981 = dma.done.wait [#allocation4], 8192  }
 0x155   :  { %982 = vsyncadd [#allocation4], 4294959104 }
 0x156   :  { %853 = vsyncpa [#allocation3], 1 }
 0x157   :  { %854 = vsyncpa [#allocation4], 1 }

</bundles_post_ra>
